<compile_context>
chip_gen: v7x
topology: tpu7x:2x2x1
jax: 0.10.0
libtpu: 0.0.40
codegen_flags: <defaults>
</compile_context>

<pallas_src>
import functools
import math

import jax
import jax.numpy as jnp
from jax.experimental import pallas as pl
from jax.experimental.pallas import tpu as pltpu

# Make the plain-JAX reference use full-precision f32 matmuls (matches in-kernel f32 MXU dots).
jax.config.update("jax_default_matmul_precision", "highest")


def _round_up(x, m):
    return (x + m - 1) // m * m


def _tile_m(m, tm_target=512):
    """Pick a row-tile size (multiple of 8, <= tm_target) and the padded M."""
    tm = min(tm_target, _round_up(m, 8))
    mp = _round_up(m, tm)
    return tm, mp


# ----------------------------- Pallas kernels -----------------------------

def _linear_kernel(x_ref, w_ref, o_ref):
    o_ref[...] = jnp.dot(x_ref[...], w_ref[...],
                         preferred_element_type=jnp.float32).astype(o_ref.dtype)


def _linear_bias_kernel(x_ref, w_ref, b_ref, o_ref):
    y = jnp.dot(x_ref[...], w_ref[...], preferred_element_type=jnp.float32) + b_ref[...]
    o_ref[...] = y.astype(o_ref.dtype)


def _ffn_kernel(x_ref, w1_ref, b1_ref, w2_ref, b2_ref, o_ref):
    # fused fc1 -> ReLU -> (dropout = identity) -> fc2, one token tile per grid step.
    x = x_ref[...]
    h = jnp.dot(x, w1_ref[...], preferred_element_type=jnp.float32) + b1_ref[...]
    h = jnp.maximum(h, 0.0)
    y = jnp.dot(h.astype(w2_ref.dtype), w2_ref[...],
                preferred_element_type=jnp.float32) + b2_ref[...]
    o_ref[...] = y.astype(o_ref.dtype)


def _add_layernorm_kernel(eps, x_ref, r_ref, g_ref, b_ref, o_ref):
    # y = gamma * (a - mean) / (std + eps) + beta, with a = x + residual and
    # std = unbiased (ddof=1) std like torch.Tensor.std default.
    a = (x_ref[...] + r_ref[...]).astype(jnp.float32)
    e = a.shape[-1]
    mean = jnp.mean(a, axis=-1, keepdims=True)
    d = a - mean
    var = jnp.sum(d * d, axis=-1, keepdims=True) / (e - 1)
    std = jnp.sqrt(var)
    y = g_ref[...] * d / (std + eps) + b_ref[...]
    o_ref[...] = y.astype(o_ref.dtype)


def _mhsa_attn_kernel(scale, q_ref, k_ref, v_ref, m_ref, o_ref):
    # One (batch, head) pair per grid step; plain 2-D MXU matmuls.
    q = q_ref[0, 0]          # (S, hd)
    k = k_ref[0, 0]          # (S, hd)
    v = v_ref[0, 0]          # (S, hd)
    m = m_ref[0, 0]          # (1, S) key-padding mask, broadcast over query rows
    s = jnp.dot(q, k.T, preferred_element_type=jnp.float32) * scale   # (S, S)
    s = jnp.where(m == 0, -jnp.inf, s)
    s = s - jnp.max(s, axis=-1, keepdims=True)
    p = jnp.exp(s)
    p = p / jnp.sum(p, axis=-1, keepdims=True)
    o = jnp.dot(p.astype(v.dtype), v, preferred_element_type=jnp.float32)
    o_ref[0, 0] = o.astype(o_ref.dtype)


# ----------------------------- pallas_call wrappers -----------------------------

def pallas_linear(x2, w, b=None, tm_target=512):
    """x2: [M, K] @ w: [K, N] (+ b: [N]) -> [M, N], tiled over M, weights VMEM-resident."""
    M, K = x2.shape
    N = w.shape[1]
    tm, Mp = _tile_m(M, tm_target)
    xp = jnp.pad(x2, ((0, Mp - M), (0, 0))) if Mp != M else x2

    in_specs = [pl.BlockSpec((tm, K), lambda i: (i, 0)),
                pl.BlockSpec((K, N), lambda i: (0, 0))]
    args = [xp, w]
    if b is not None:
        in_specs.append(pl.BlockSpec((1, N), lambda i: (0, 0)))
        args.append(b.reshape(1, N))
        kernel = _linear_bias_kernel
    else:
        kernel = _linear_kernel

    out = pl.pallas_call(
        kernel,
        out_shape=jax.ShapeDtypeStruct((Mp, N), x2.dtype),
        grid_spec=pltpu.PrefetchScalarGridSpec(
            num_scalar_prefetch=0,
            grid=(Mp // tm,),
            in_specs=in_specs,
            out_specs=pl.BlockSpec((tm, N), lambda i: (i, 0)),
        ),
        compiler_params=pltpu.CompilerParams(dimension_semantics=("parallel",)),
    )(*args)
    return out[:M] if Mp != M else out


def pallas_ffn(x2, w1, b1, w2, b2, tm_target=512):
    """Fused positionwise FFN: [M, E] -> [M, E], tiled over M."""
    M, E = x2.shape
    H = w1.shape[1]
    tm, Mp = _tile_m(M, tm_target)
    xp = jnp.pad(x2, ((0, Mp - M), (0, 0))) if Mp != M else x2

    out = pl.pallas_call(
        _ffn_kernel,
        out_shape=jax.ShapeDtypeStruct((Mp, E), x2.dtype),
        grid_spec=pltpu.PrefetchScalarGridSpec(
            num_scalar_prefetch=0,
            grid=(Mp // tm,),
            in_specs=[
                pl.BlockSpec((tm, E), lambda i: (i, 0)),
                pl.BlockSpec((E, H), lambda i: (0, 0)),
                pl.BlockSpec((1, H), lambda i: (0, 0)),
                pl.BlockSpec((H, E), lambda i: (0, 0)),
                pl.BlockSpec((1, E), lambda i: (0, 0)),
            ],
            out_specs=pl.BlockSpec((tm, E), lambda i: (i, 0)),
        ),
        compiler_params=pltpu.CompilerParams(dimension_semantics=("parallel",)),
    )(xp, w1, b1.reshape(1, H), w2, b2.reshape(1, E))
    return out[:M] if Mp != M else out


def pallas_add_layernorm(x2, r2, gamma, beta, eps=1e-10, tm_target=512):
    """(x + residual) then LayerNorm over last dim; [M, E] -> [M, E]."""
    M, E = x2.shape
    tm, Mp = _tile_m(M, tm_target)
    if Mp != M:
        x2 = jnp.pad(x2, ((0, Mp - M), (0, 0)))
        r2 = jnp.pad(r2, ((0, Mp - M), (0, 0)))

    out = pl.pallas_call(
        functools.partial(_add_layernorm_kernel, eps),
        out_shape=jax.ShapeDtypeStruct((Mp, E), x2.dtype),
        grid_spec=pltpu.PrefetchScalarGridSpec(
            num_scalar_prefetch=0,
            grid=(Mp // tm,),
            in_specs=[
                pl.BlockSpec((tm, E), lambda i: (i, 0)),
                pl.BlockSpec((tm, E), lambda i: (i, 0)),
                pl.BlockSpec((1, E), lambda i: (0, 0)),
                pl.BlockSpec((1, E), lambda i: (0, 0)),
            ],
            out_specs=pl.BlockSpec((tm, E), lambda i: (i, 0)),
        ),
        compiler_params=pltpu.CompilerParams(dimension_semantics=("parallel",)),
    )(x2, r2, gamma.reshape(1, E), beta.reshape(1, E))
    return out[:M] if Mp != M else out


def pallas_mhsa_attention(qh, kh, vh, p_mask):
    """qh/kh/vh: [B, H, S, hd]; p_mask: [B, 1, 1, S]; returns [B, H, S, hd]."""
    B, H, S, hd = qh.shape
    scale = 1.0 / math.sqrt(hd)
    qkv_spec = pl.BlockSpec((1, 1, S, hd), lambda b, h: (b, h, 0, 0))
    out = pl.pallas_call(
        functools.partial(_mhsa_attn_kernel, scale),
        out_shape=jax.ShapeDtypeStruct((B, H, S, hd), qh.dtype),
        grid_spec=pltpu.PrefetchScalarGridSpec(
            num_scalar_prefetch=0,
            grid=(B, H),
            in_specs=[qkv_spec, qkv_spec, qkv_spec,
                      pl.BlockSpec((1, 1, 1, S), lambda b, h: (b, 0, 0, 0))],
            out_specs=pl.BlockSpec((1, 1, S, hd), lambda b, h: (b, h, 0, 0)),
        ),
        compiler_params=pltpu.CompilerParams(
            dimension_semantics=("parallel", "parallel")),
    )(qh, kh, vh, p_mask)
    return out


# ----------------------------- Encoder forward -----------------------------

def encoder_layer_forward(p, x, p_mask, heads, eps=1e-10):
    B, S, E = x.shape
    hd = E // heads
    M = B * S
    x2 = x.reshape(M, E)

    # --- MHSA (q/k/v projections fused into one matmul; projections have no bias) ---
    qkv = pallas_linear(x2, p["wqkv"])                # (M, 3E)
    q2, k2, v2 = jnp.split(qkv, 3, axis=-1)

    def to_heads(t):
        return t.reshape(B, S, heads, hd).transpose(0, 2, 1, 3)

    attn = pallas_mhsa_attention(to_heads(q2), to_heads(k2), to_heads(v2), p_mask)
    attn2 = attn.transpose(0, 2, 1, 3).reshape(M, E)
    mhsa_out = pallas_linear(attn2, p["wo"], p["bo"])

    # --- Add & LayerNorm 1 (drop1 = identity in eval) ---
    x2 = pallas_add_layernorm(x2, mhsa_out, p["g1"], p["be1"], eps)

    # --- FFN ---
    ffn_out = pallas_ffn(x2, p["w1"], p["b1"], p["w2"], p["b2"])

    # --- Add & LayerNorm 2 (drop2 = identity in eval) ---
    x2 = pallas_add_layernorm(x2, ffn_out, p["g2"], p["be2"], eps)
    return x2.reshape(B, S, E)


def encoder_forward(params, token_ids, p_mask, heads):
    # Token embedding gather + positional encoding in plain JAX (gather has no clean
    # BlockSpec form; would need scalar-prefetch DMA).  Embedding dropout = identity (eval).
    # TODO(synk): scalar-prefetch gather kernel for very large vocab/embed sizes.
    B, S = token_ids.shape
    x = params["emb"][token_ids] + params["pos_enc"][:S][None, :, :]
    p_mask = p_mask.astype(jnp.float32)
    for lp in params["layers"]:
        x = encoder_layer_forward(lp, x, p_mask, heads)
    return x


# ----------------------------- plain-JAX reference -----------------------------

def ref_encoder(params, token_ids, p_mask, heads, eps=1e-10):
    B, S = token_ids.shape
    x = params["emb"][token_ids] + params["pos_enc"][:S][None, :, :]
    E = x.shape[-1]
    hd = E // heads

    def add_ln(a, r, g, be):
        y = a + r
        mean = jnp.mean(y, axis=-1, keepdims=True)
        d = y - mean
        var = jnp.sum(d * d, axis=-1, keepdims=True) / (E - 1)
        std = jnp.sqrt(var)
        return g * d / (std + eps) + be

    for lp in params["layers"]:
        x2 = x.reshape(B * S, E)
        qkv = x2 @ lp["wqkv"]
        q2, k2, v2 = jnp.split(qkv, 3, axis=-1)

        def to_heads(t):
            return t.reshape(B, S, heads, hd).transpose(0, 2, 1, 3)

        q, k, v = to_heads(q2), to_heads(k2), to_heads(v2)
        s = jnp.einsum("bhqd,bhkd->bhqk", q, k) / math.sqrt(hd)
        s = jnp.where(p_mask == 0, -jnp.inf, s)
        s = s - jnp.max(s, axis=-1, keepdims=True)
        pw = jnp.exp(s)
        pw = pw / jnp.sum(pw, axis=-1, keepdims=True)
        o = jnp.einsum("bhqk,bhkd->bhqd", pw, v)
        o2 = o.transpose(0, 2, 1, 3).reshape(B * S, E)
        mhsa = o2 @ lp["wo"] + lp["bo"]
        x2 = add_ln(x2, mhsa, lp["g1"], lp["be1"])
        h = jnp.maximum(x2 @ lp["w1"] + lp["b1"], 0.0)
        ffn = h @ lp["w2"] + lp["b2"]
        x2 = add_ln(x2, ffn, lp["g2"], lp["be2"])
        x = x2.reshape(B, S, E)
    return x


# ----------------------------- demo / check -----------------------------

if __name__ == "__main__":
    B, S, E, heads, FFN_H = 2, 8, 32, 4, 64
    num_layers, vocab, max_len = 2, 50, 16

    key = jax.random.PRNGKey(0)
    key, ke, kt = jax.random.split(key, 3)

    # Token embedding table (padding_idx=1 -> zero row) and sinusoidal positional encoding.
    emb = jax.random.normal(ke, (vocab, E), jnp.float32) * 0.1
    emb = emb.at[1].set(0.0)
    pos = jnp.arange(max_len, dtype=jnp.float32)[:, None]
    _2i = jnp.arange(0, E, 2, dtype=jnp.float32)
    angle = pos / jnp.power(10000.0, _2i / E)
    pos_enc = jnp.zeros((max_len, E), jnp.float32)
    pos_enc = pos_enc.at[:, 0::2].set(jnp.sin(angle))
    pos_enc = pos_enc.at[:, 1::2].set(jnp.cos(angle))

    layers = []
    for _ in range(num_layers):
        key, *ks = jax.random.split(key, 12)
        layers.append(dict(
            wqkv=jax.random.normal(ks[0], (E, 3 * E), jnp.float32) / math.sqrt(E),
            wo=jax.random.normal(ks[1], (E, E), jnp.float32) / math.sqrt(E),
            bo=jax.random.normal(ks[2], (E,), jnp.float32) * 0.01,
            g1=1.0 + 0.1 * jax.random.normal(ks[3], (E,), jnp.float32),
            be1=0.01 * jax.random.normal(ks[4], (E,), jnp.float32),
            w1=jax.random.normal(ks[5], (E, FFN_H), jnp.float32) / math.sqrt(E),
            b1=jax.random.normal(ks[6], (FFN_H,), jnp.float32) * 0.01,
            w2=jax.random.normal(ks[7], (FFN_H, E), jnp.float32) / math.sqrt(FFN_H),
            b2=jax.random.normal(ks[8], (E,), jnp.float32) * 0.01,
            g2=1.0 + 0.1 * jax.random.normal(ks[9], (E,), jnp.float32),
            be2=0.01 * jax.random.normal(ks[10], (E,), jnp.float32),
        ))
    params = dict(emb=emb, pos_enc=pos_enc, layers=layers)

    token_ids = jax.random.randint(kt, (B, S), 0, vocab)
    # Padding mask: batch 0 has all 8 tokens valid, batch 1 has 5 valid tokens.
    lengths = jnp.array([S, 5])
    p_mask = (jnp.arange(S)[None, :] < lengths[:, None]).astype(jnp.int32)[:, None, None, :]

    fwd = jax.jit(functools.partial(encoder_forward, heads=heads))
    y = fwd(params, token_ids, p_mask)
    jax.block_until_ready(y)

    ref = ref_encoder(params, token_ids, p_mask, heads)
    max_diff = float(jnp.max(jnp.abs(y - ref)))
    assert jnp.allclose(y, ref, atol=1e-3, rtol=1e-3), f"max abs diff {max_diff}"

    print("KERNEL_OK")
</pallas_src>

<mosaic_0001>
module attributes {stable_mosaic.version = 11 : i64} {
  func.func @_mhsa_attn_kernel(%arg0: i32, %arg1: i32, %arg2: memref<1x1x8x8xf32, #tpu.memory_space<vmem>>, %arg3: memref<1x1x8x8xf32, #tpu.memory_space<vmem>>, %arg4: memref<1x1x8x8xf32, #tpu.memory_space<vmem>>, %arg5: memref<1x1x1x8xf32, #tpu.memory_space<vmem>>, %arg6: memref<1x1x8x8xf32, #tpu.memory_space<vmem>>) attributes {dimension_semantics = [#tpu.dimension_semantics<parallel>, #tpu.dimension_semantics<parallel>], iteration_bounds = array<i64: 2, 4>, scalar_prefetch = 0 : i64, scratch_operands = 0 : i64, tpu.core_type = #tpu.core_type<tc>, window_params = [{transform_indices = @transform_0, window_bounds = array<i64: 1, 1, 8, 8>}, {transform_indices = @transform_1, window_bounds = array<i64: 1, 1, 8, 8>}, {transform_indices = @transform_2, window_bounds = array<i64: 1, 1, 8, 8>}, {transform_indices = @transform_3, window_bounds = array<i64: 1, 1, 1, 8>}, {transform_indices = @transform_4, window_bounds = array<i64: 1, 1, 8, 8>}]} {
    %c0 = arith.constant 0 : index
    %c0_0 = arith.constant 0 : index
    %c0_1 = arith.constant 0 : index
    %c0_2 = arith.constant 0 : index
    %0 = vector.load %arg2[%c0, %c0_0, %c0_1, %c0_2] : memref<1x1x8x8xf32, #tpu.memory_space<vmem>>, vector<1x1x8x8xf32>
    %1 = vector.shape_cast %0 : vector<1x1x8x8xf32> to vector<8x8xf32>
    %c0_3 = arith.constant 0 : index
    %c0_4 = arith.constant 0 : index
    %c0_5 = arith.constant 0 : index
    %c0_6 = arith.constant 0 : index
    %2 = vector.load %arg3[%c0_3, %c0_4, %c0_5, %c0_6] : memref<1x1x8x8xf32, #tpu.memory_space<vmem>>, vector<1x1x8x8xf32>
    %3 = vector.shape_cast %2 : vector<1x1x8x8xf32> to vector<8x8xf32>
    %c0_7 = arith.constant 0 : index
    %c0_8 = arith.constant 0 : index
    %c0_9 = arith.constant 0 : index
    %c0_10 = arith.constant 0 : index
    %4 = vector.load %arg4[%c0_7, %c0_8, %c0_9, %c0_10] : memref<1x1x8x8xf32, #tpu.memory_space<vmem>>, vector<1x1x8x8xf32>
    %5 = vector.shape_cast %4 : vector<1x1x8x8xf32> to vector<8x8xf32>
    %c0_11 = arith.constant 0 : index
    %c0_12 = arith.constant 0 : index
    %c0_13 = arith.constant 0 : index
    %c0_14 = arith.constant 0 : index
    %6 = vector.load %arg5[%c0_11, %c0_12, %c0_13, %c0_14] : memref<1x1x1x8xf32, #tpu.memory_space<vmem>>, vector<1x1x1x8xf32>
    %7 = vector.shape_cast %6 : vector<1x1x1x8xf32> to vector<1x8xf32>
    %8 = tpu.transpose %3, [1, 0] : vector<8x8xf32> -> vector<8x8xf32>
    %cst = arith.constant dense<0.000000e+00> : vector<8x8xf32>
    %9 = tpu.matmul %1, %8, %cst {dimension_numbers = #tpu.dot_dimension_numbers<[1], [0], [0], [1], [0, 0, 1, 1], [], []>, precision = #tpu.contract_precision<fp32>} : vector<8x8xf32>, vector<8x8xf32>, vector<8x8xf32> -> vector<8x8xf32>
    %cst_15 = arith.constant 0.353553385 : f32
    %10 = vector.broadcast %cst_15 : f32 to vector<8x8xf32>
    %11 = arith.mulf %9, %10 : vector<8x8xf32>
    %cst_16 = arith.constant 0.000000e+00 : f32
    %12 = vector.broadcast %cst_16 : f32 to vector<1x8xf32>
    %13 = arith.cmpf oeq, %7, %12 : vector<1x8xf32>
    %cst_17 = arith.constant 0xFF800000 : f32
    %14 = vector.shape_cast %13 : vector<1x8xi1> to vector<1x8xi1>
    %15 = vector.broadcast %14 : vector<1x8xi1> to vector<8x8xi1>
    %16 = vector.broadcast %cst_17 : f32 to vector<8x8xf32>
    %17 = arith.select %15, %16, %11 : vector<8x8xi1>, vector<8x8xf32>
    %cst_18 = arith.constant dense<0xFF800000> : vector<8xf32>
    %18 = vector.multi_reduction <maximumf>, %17, %cst_18 [1] : vector<8x8xf32> to vector<8xf32>
    %19 = vector.shape_cast %18 : vector<8xf32> to vector<8x1xf32>
    %20 = vector.broadcast %19 : vector<8x1xf32> to vector<8x8xf32>
    %21 = arith.subf %17, %20 : vector<8x8xf32>
    %22 = math.exp %21 : vector<8x8xf32>
    %cst_19 = arith.constant dense<0.000000e+00> : vector<8xf32>
    %23 = vector.multi_reduction <add>, %22, %cst_19 [1] : vector<8x8xf32> to vector<8xf32>
    %24 = vector.shape_cast %23 : vector<8xf32> to vector<8x1xf32>
    %25 = vector.broadcast %24 : vector<8x1xf32> to vector<8x8xf32>
    %26 = arith.divf %22, %25 : vector<8x8xf32>
    %cst_20 = arith.constant dense<0.000000e+00> : vector<8x8xf32>
    %27 = tpu.matmul %26, %5, %cst_20 {dimension_numbers = #tpu.dot_dimension_numbers<[1], [0], [0], [1], [0, 0, 1, 1], [], []>, precision = #tpu.contract_precision<fp32>} : vector<8x8xf32>, vector<8x8xf32>, vector<8x8xf32> -> vector<8x8xf32>
    %c0_21 = arith.constant 0 : index
    %c0_22 = arith.constant 0 : index
    %c0_23 = arith.constant 0 : index
    %c0_24 = arith.constant 0 : index
    %28 = vector.load %arg6[%c0_21, %c0_22, %c0_23, %c0_24] : memref<1x1x8x8xf32, #tpu.memory_space<vmem>>, vector<1x1x8x8xf32>
    %29 = vector.shape_cast %28 : vector<1x1x8x8xf32> to vector<8x8xf32>
    %30 = vector.shape_cast %27 : vector<8x8xf32> to vector<1x1x8x8xf32>
    tpu.vector_store %arg6[%c0_21, %c0_22, %c0_23, %c0_24], %30 {strides = array<i32>} : memref<1x1x8x8xf32, #tpu.memory_space<vmem>>, vector<1x1x8x8xf32>,
    return
  }
  func.func @transform_0(%arg0: i32, %arg1: i32) -> (i32, i32, i32, i32) {
    %c0_i32 = arith.constant 0 : i32
    %c0_i32_0 = arith.constant 0 : i32
    %c0_i32_1 = arith.constant 0 : i32
    return %arg0, %arg1, %c0_i32, %c0_i32_0 : i32, i32, i32, i32
  }
  func.func @transform_1(%arg0: i32, %arg1: i32) -> (i32, i32, i32, i32) {
    %c0_i32 = arith.constant 0 : i32
    %c0_i32_0 = arith.constant 0 : i32
    %c0_i32_1 = arith.constant 0 : i32
    return %arg0, %arg1, %c0_i32, %c0_i32_0 : i32, i32, i32, i32
  }
  func.func @transform_2(%arg0: i32, %arg1: i32) -> (i32, i32, i32, i32) {
    %c0_i32 = arith.constant 0 : i32
    %c0_i32_0 = arith.constant 0 : i32
    %c0_i32_1 = arith.constant 0 : i32
    return %arg0, %arg1, %c0_i32, %c0_i32_0 : i32, i32, i32, i32
  }
  func.func @transform_3(%arg0: i32, %arg1: i32) -> (i32, i32, i32, i32) {
    %c0_i32 = arith.constant 0 : i32
    %c0_i32_0 = arith.constant 0 : i32
    %c0_i32_1 = arith.constant 0 : i32
    %c0_i32_2 = arith.constant 0 : i32
    return %arg0, %c0_i32, %c0_i32_0, %c0_i32_1 : i32, i32, i32, i32
  }
  func.func @transform_4(%arg0: i32, %arg1: i32) -> (i32, i32, i32, i32) {
    %c0_i32 = arith.constant 0 : i32
    %c0_i32_0 = arith.constant 0 : i32
    %c0_i32_1 = arith.constant 0 : i32
    return %arg0, %arg1, %c0_i32, %c0_i32_0 : i32, i32, i32, i32
  }
}

module attributes {stable_mosaic.version = 11 : i64} {
  func.func @_linear_bias_kernel(%arg0: i32, %arg1: memref<16x32xf32, #tpu.memory_space<vmem>>, %arg2: memref<32x32xf32, #tpu.memory_space<vmem>>, %arg3: memref<1x32xf32, #tpu.memory_space<vmem>>, %arg4: memref<16x32xf32, #tpu.memory_space<vmem>>) attributes {dimension_semantics = [#tpu.dimension_semantics<parallel>], iteration_bounds = array<i64: 1>, scalar_prefetch = 0 : i64, scratch_operands = 0 : i64, tpu.core_type = #tpu.core_type<tc>, window_params = [{transform_indices = @transform_0, window_bounds = array<i64: 16, 32>}, {pipeline_mode = #tpu.pipeline_mode<synchronous>, transform_indices = @transform_1, window_bounds = array<i64: 32, 32>}, {pipeline_mode = #tpu.pipeline_mode<synchronous>, transform_indices = @transform_2, window_bounds = array<i64: 1, 32>}, {transform_indices = @transform_3, window_bounds = array<i64: 16, 32>}]} {
    %c0 = arith.constant 0 : index
    %c0_0 = arith.constant 0 : index
    %0 = vector.load %arg1[%c0, %c0_0] : memref<16x32xf32, #tpu.memory_space<vmem>>, vector<16x32xf32>
    %c0_1 = arith.constant 0 : index
    %c0_2 = arith.constant 0 : index
    %1 = vector.load %arg2[%c0_1, %c0_2] : memref<32x32xf32, #tpu.memory_space<vmem>>, vector<32x32xf32>
    %cst = arith.constant dense<0.000000e+00> : vector<16x32xf32>
    %2 = tpu.matmul %0, %1, %cst {dimension_numbers = #tpu.dot_dimension_numbers<[1], [0], [0], [1], [0, 0, 1, 1], [], []>, precision = #tpu.contract_precision<fp32>} : vector<16x32xf32>, vector<32x32xf32>, vector<16x32xf32> -> vector<16x32xf32>
    %c0_3 = arith.constant 0 : index
    %c0_4 = arith.constant 0 : index
    %3 = vector.load %arg3[%c0_3, %c0_4] : memref<1x32xf32, #tpu.memory_space<vmem>>, vector<1x32xf32>
    %4 = vector.broadcast %3 : vector<1x32xf32> to vector<16x32xf32>
    %5 = arith.addf %2, %4 : vector<16x32xf32>
    %c0_5 = arith.constant 0 : index
    %c0_6 = arith.constant 0 : index
    %6 = vector.load %arg4[%c0_5, %c0_6] : memref<16x32xf32, #tpu.memory_space<vmem>>, vector<16x32xf32>
    tpu.vector_store %arg4[%c0_5, %c0_6], %5 {strides = array<i32>} : memref<16x32xf32, #tpu.memory_space<vmem>>, vector<16x32xf32>,
    return
  }
  func.func @transform_0(%arg0: i32) -> (i32, i32) {
    %c0_i32 = arith.constant 0 : i32
    %c0_i32_0 = arith.constant 0 : i32
    return %arg0, %c0_i32 : i32, i32
  }
  func.func @transform_1(%arg0: i32) -> (i32, i32) {
    %c0_i32 = arith.constant 0 : i32
    %c0_i32_0 = arith.constant 0 : i32
    %c0_i32_1 = arith.constant 0 : i32
    return %c0_i32, %c0_i32_0 : i32, i32
  }
  func.func @transform_2(%arg0: i32) -> (i32, i32) {
    %c0_i32 = arith.constant 0 : i32
    %c0_i32_0 = arith.constant 0 : i32
    %c0_i32_1 = arith.constant 0 : i32
    return %c0_i32, %c0_i32_0 : i32, i32
  }
  func.func @transform_3(%arg0: i32) -> (i32, i32) {
    %c0_i32 = arith.constant 0 : i32
    %c0_i32_0 = arith.constant 0 : i32
    return %arg0, %c0_i32 : i32, i32
  }
}

module attributes {stable_mosaic.version = 11 : i64} {
  func.func @_linear_kernel(%arg0: i32, %arg1: memref<16x32xf32, #tpu.memory_space<vmem>>, %arg2: memref<32x96xf32, #tpu.memory_space<vmem>>, %arg3: memref<16x96xf32, #tpu.memory_space<vmem>>) attributes {dimension_semantics = [#tpu.dimension_semantics<parallel>], iteration_bounds = array<i64: 1>, scalar_prefetch = 0 : i64, scratch_operands = 0 : i64, tpu.core_type = #tpu.core_type<tc>, window_params = [{transform_indices = @transform_0, window_bounds = array<i64: 16, 32>}, {pipeline_mode = #tpu.pipeline_mode<synchronous>, transform_indices = @transform_1, window_bounds = array<i64: 32, 96>}, {transform_indices = @transform_2, window_bounds = array<i64: 16, 96>}]} {
    %c0 = arith.constant 0 : index
    %c0_0 = arith.constant 0 : index
    %0 = vector.load %arg1[%c0, %c0_0] : memref<16x32xf32, #tpu.memory_space<vmem>>, vector<16x32xf32>
    %c0_1 = arith.constant 0 : index
    %c0_2 = arith.constant 0 : index
    %1 = vector.load %arg2[%c0_1, %c0_2] : memref<32x96xf32, #tpu.memory_space<vmem>>, vector<32x96xf32>
    %cst = arith.constant dense<0.000000e+00> : vector<16x96xf32>
    %2 = tpu.matmul %0, %1, %cst {dimension_numbers = #tpu.dot_dimension_numbers<[1], [0], [0], [1], [0, 0, 1, 1], [], []>, precision = #tpu.contract_precision<fp32>} : vector<16x32xf32>, vector<32x96xf32>, vector<16x96xf32> -> vector<16x96xf32>
    %c0_3 = arith.constant 0 : index
    %c0_4 = arith.constant 0 : index
    %3 = vector.load %arg3[%c0_3, %c0_4] : memref<16x96xf32, #tpu.memory_space<vmem>>, vector<16x96xf32>
    tpu.vector_store %arg3[%c0_3, %c0_4], %2 {strides = array<i32>} : memref<16x96xf32, #tpu.memory_space<vmem>>, vector<16x96xf32>,
    return
  }
  func.func @transform_0(%arg0: i32) -> (i32, i32) {
    %c0_i32 = arith.constant 0 : i32
    %c0_i32_0 = arith.constant 0 : i32
    return %arg0, %c0_i32 : i32, i32
  }
  func.func @transform_1(%arg0: i32) -> (i32, i32) {
    %c0_i32 = arith.constant 0 : i32
    %c0_i32_0 = arith.constant 0 : i32
    %c0_i32_1 = arith.constant 0 : i32
    return %c0_i32, %c0_i32_0 : i32, i32
  }
  func.func @transform_2(%arg0: i32) -> (i32, i32) {
    %c0_i32 = arith.constant 0 : i32
    %c0_i32_0 = arith.constant 0 : i32
    return %arg0, %c0_i32 : i32, i32
  }
}

module attributes {stable_mosaic.version = 11 : i64} {
  func.func @_add_layernorm_kernel(%arg0: i32, %arg1: memref<16x32xf32, #tpu.memory_space<vmem>>, %arg2: memref<16x32xf32, #tpu.memory_space<vmem>>, %arg3: memref<1x32xf32, #tpu.memory_space<vmem>>, %arg4: memref<1x32xf32, #tpu.memory_space<vmem>>, %arg5: memref<16x32xf32, #tpu.memory_space<vmem>>) attributes {dimension_semantics = [#tpu.dimension_semantics<parallel>], iteration_bounds = array<i64: 1>, scalar_prefetch = 0 : i64, scratch_operands = 0 : i64, tpu.core_type = #tpu.core_type<tc>, window_params = [{transform_indices = @transform_0, window_bounds = array<i64: 16, 32>}, {transform_indices = @transform_1, window_bounds = array<i64: 16, 32>}, {pipeline_mode = #tpu.pipeline_mode<synchronous>, transform_indices = @transform_2, window_bounds = array<i64: 1, 32>}, {pipeline_mode = #tpu.pipeline_mode<synchronous>, transform_indices = @transform_3, window_bounds = array<i64: 1, 32>}, {transform_indices = @transform_4, window_bounds = array<i64: 16, 32>}]} {
    %c0 = arith.constant 0 : index
    %c0_0 = arith.constant 0 : index
    %0 = vector.load %arg1[%c0, %c0_0] : memref<16x32xf32, #tpu.memory_space<vmem>>, vector<16x32xf32>
    %c0_1 = arith.constant 0 : index
    %c0_2 = arith.constant 0 : index
    %1 = vector.load %arg2[%c0_1, %c0_2] : memref<16x32xf32, #tpu.memory_space<vmem>>, vector<16x32xf32>
    %2 = arith.addf %0, %1 : vector<16x32xf32>
    %cst = arith.constant dense<0.000000e+00> : vector<16xf32>
    %3 = vector.multi_reduction <add>, %2, %cst [1] : vector<16x32xf32> to vector<16xf32>
    %4 = vector.shape_cast %3 : vector<16xf32> to vector<16x1xf32>
    %cst_3 = arith.constant 3.200000e+01 : f32
    %5 = vector.broadcast %cst_3 : f32 to vector<16x1xf32>
    %6 = arith.divf %4, %5 : vector<16x1xf32>
    %7 = vector.broadcast %6 : vector<16x1xf32> to vector<16x32xf32>
    %8 = arith.subf %2, %7 : vector<16x32xf32>
    %9 = arith.mulf %8, %8 : vector<16x32xf32>
    %cst_4 = arith.constant dense<0.000000e+00> : vector<16xf32>
    %10 = vector.multi_reduction <add>, %9, %cst_4 [1] : vector<16x32xf32> to vector<16xf32>
    %11 = vector.shape_cast %10 : vector<16xf32> to vector<16x1xf32>
    %cst_5 = arith.constant 3.100000e+01 : f32
    %12 = vector.broadcast %cst_5 : f32 to vector<16x1xf32>
    %13 = arith.divf %11, %12 : vector<16x1xf32>
    %14 = math.sqrt %13 : vector<16x1xf32>
    %c0_6 = arith.constant 0 : index
    %c0_7 = arith.constant 0 : index
    %15 = vector.load %arg3[%c0_6, %c0_7] : memref<1x32xf32, #tpu.memory_space<vmem>>, vector<1x32xf32>
    %16 = vector.broadcast %15 : vector<1x32xf32> to vector<16x32xf32>
    %17 = arith.mulf %16, %8 : vector<16x32xf32>
    %cst_8 = arith.constant 1.000000e-10 : f32
    %18 = vector.broadcast %cst_8 : f32 to vector<16x1xf32>
    %19 = arith.addf %14, %18 : vector<16x1xf32>
    %20 = vector.broadcast %19 : vector<16x1xf32> to vector<16x32xf32>
    %21 = arith.divf %17, %20 : vector<16x32xf32>
    %c0_9 = arith.constant 0 : index
    %c0_10 = arith.constant 0 : index
    %22 = vector.load %arg4[%c0_9, %c0_10] : memref<1x32xf32, #tpu.memory_space<vmem>>, vector<1x32xf32>
    %23 = vector.broadcast %22 : vector<1x32xf32> to vector<16x32xf32>
    %24 = arith.addf %21, %23 : vector<16x32xf32>
    %c0_11 = arith.constant 0 : index
    %c0_12 = arith.constant 0 : index
    %25 = vector.load %arg5[%c0_11, %c0_12] : memref<16x32xf32, #tpu.memory_space<vmem>>, vector<16x32xf32>
    tpu.vector_store %arg5[%c0_11, %c0_12], %24 {strides = array<i32>} : memref<16x32xf32, #tpu.memory_space<vmem>>, vector<16x32xf32>,
    return
  }
  func.func @transform_0(%arg0: i32) -> (i32, i32) {
    %c0_i32 = arith.constant 0 : i32
    %c0_i32_0 = arith.constant 0 : i32
    return %arg0, %c0_i32 : i32, i32
  }
  func.func @transform_1(%arg0: i32) -> (i32, i32) {
    %c0_i32 = arith.constant 0 : i32
    %c0_i32_0 = arith.constant 0 : i32
    return %arg0, %c0_i32 : i32, i32
  }
  func.func @transform_2(%arg0: i32) -> (i32, i32) {
    %c0_i32 = arith.constant 0 : i32
    %c0_i32_0 = arith.constant 0 : i32
    %c0_i32_1 = arith.constant 0 : i32
    return %c0_i32, %c0_i32_0 : i32, i32
  }
  func.func @transform_3(%arg0: i32) -> (i32, i32) {
    %c0_i32 = arith.constant 0 : i32
    %c0_i32_0 = arith.constant 0 : i32
    %c0_i32_1 = arith.constant 0 : i32
    return %c0_i32, %c0_i32_0 : i32, i32
  }
  func.func @transform_4(%arg0: i32) -> (i32, i32) {
    %c0_i32 = arith.constant 0 : i32
    %c0_i32_0 = arith.constant 0 : i32
    return %arg0, %c0_i32 : i32, i32
  }
}

module attributes {stable_mosaic.version = 11 : i64} {
  func.func @_ffn_kernel(%arg0: i32, %arg1: memref<16x32xf32, #tpu.memory_space<vmem>>, %arg2: memref<32x64xf32, #tpu.memory_space<vmem>>, %arg3: memref<1x64xf32, #tpu.memory_space<vmem>>, %arg4: memref<64x32xf32, #tpu.memory_space<vmem>>, %arg5: memref<1x32xf32, #tpu.memory_space<vmem>>, %arg6: memref<16x32xf32, #tpu.memory_space<vmem>>) attributes {dimension_semantics = [#tpu.dimension_semantics<parallel>], iteration_bounds = array<i64: 1>, scalar_prefetch = 0 : i64, scratch_operands = 0 : i64, tpu.core_type = #tpu.core_type<tc>, window_params = [{transform_indices = @transform_0, window_bounds = array<i64: 16, 32>}, {pipeline_mode = #tpu.pipeline_mode<synchronous>, transform_indices = @transform_1, window_bounds = array<i64: 32, 64>}, {pipeline_mode = #tpu.pipeline_mode<synchronous>, transform_indices = @transform_2, window_bounds = array<i64: 1, 64>}, {pipeline_mode = #tpu.pipeline_mode<synchronous>, transform_indices = @transform_3, window_bounds = array<i64: 64, 32>}, {pipeline_mode = #tpu.pipeline_mode<synchronous>, transform_indices = @transform_4, window_bounds = array<i64: 1, 32>}, {transform_indices = @transform_5, window_bounds = array<i64: 16, 32>}]} {
    %c0 = arith.constant 0 : index
    %c0_0 = arith.constant 0 : index
    %0 = vector.load %arg1[%c0, %c0_0] : memref<16x32xf32, #tpu.memory_space<vmem>>, vector<16x32xf32>
    %c0_1 = arith.constant 0 : index
    %c0_2 = arith.constant 0 : index
    %1 = vector.load %arg2[%c0_1, %c0_2] : memref<32x64xf32, #tpu.memory_space<vmem>>, vector<32x64xf32>
    %cst = arith.constant dense<0.000000e+00> : vector<16x64xf32>
    %2 = tpu.matmul %0, %1, %cst {dimension_numbers = #tpu.dot_dimension_numbers<[1], [0], [0], [1], [0, 0, 1, 1], [], []>, precision = #tpu.contract_precision<fp32>} : vector<16x32xf32>, vector<32x64xf32>, vector<16x64xf32> -> vector<16x64xf32>
    %c0_3 = arith.constant 0 : index
    %c0_4 = arith.constant 0 : index
    %3 = vector.load %arg3[%c0_3, %c0_4] : memref<1x64xf32, #tpu.memory_space<vmem>>, vector<1x64xf32>
    %4 = vector.broadcast %3 : vector<1x64xf32> to vector<16x64xf32>
    %5 = arith.addf %2, %4 : vector<16x64xf32>
    %cst_5 = arith.constant 0.000000e+00 : f32
    %6 = vector.broadcast %cst_5 : f32 to vector<16x64xf32>
    %7 = arith.maximumf %5, %6 : vector<16x64xf32>
    %c0_6 = arith.constant 0 : index
    %c0_7 = arith.constant 0 : index
    %8 = vector.load %arg4[%c0_6, %c0_7] : memref<64x32xf32, #tpu.memory_space<vmem>>, vector<64x32xf32>
    %cst_8 = arith.constant dense<0.000000e+00> : vector<16x32xf32>
    %9 = tpu.matmul %7, %8, %cst_8 {dimension_numbers = #tpu.dot_dimension_numbers<[1], [0], [0], [1], [0, 0, 1, 1], [], []>, precision = #tpu.contract_precision<fp32>} : vector<16x64xf32>, vector<64x32xf32>, vector<16x32xf32> -> vector<16x32xf32>
    %c0_9 = arith.constant 0 : index
    %c0_10 = arith.constant 0 : index
    %10 = vector.load %arg5[%c0_9, %c0_10] : memref<1x32xf32, #tpu.memory_space<vmem>>, vector<1x32xf32>
    %11 = vector.broadcast %10 : vector<1x32xf32> to vector<16x32xf32>
    %12 = arith.addf %9, %11 : vector<16x32xf32>
    %c0_11 = arith.constant 0 : index
    %c0_12 = arith.constant 0 : index
    %13 = vector.load %arg6[%c0_11, %c0_12] : memref<16x32xf32, #tpu.memory_space<vmem>>, vector<16x32xf32>
    tpu.vector_store %arg6[%c0_11, %c0_12], %12 {strides = array<i32>} : memref<16x32xf32, #tpu.memory_space<vmem>>, vector<16x32xf32>,
    return
  }
  func.func @transform_0(%arg0: i32) -> (i32, i32) {
    %c0_i32 = arith.constant 0 : i32
    %c0_i32_0 = arith.constant 0 : i32
    return %arg0, %c0_i32 : i32, i32
  }
  func.func @transform_1(%arg0: i32) -> (i32, i32) {
    %c0_i32 = arith.constant 0 : i32
    %c0_i32_0 = arith.constant 0 : i32
    %c0_i32_1 = arith.constant 0 : i32
    return %c0_i32, %c0_i32_0 : i32, i32
  }
  func.func @transform_2(%arg0: i32) -> (i32, i32) {
    %c0_i32 = arith.constant 0 : i32
    %c0_i32_0 = arith.constant 0 : i32
    %c0_i32_1 = arith.constant 0 : i32
    return %c0_i32, %c0_i32_0 : i32, i32
  }
  func.func @transform_3(%arg0: i32) -> (i32, i32) {
    %c0_i32 = arith.constant 0 : i32
    %c0_i32_0 = arith.constant 0 : i32
    %c0_i32_1 = arith.constant 0 : i32
    return %c0_i32, %c0_i32_0 : i32, i32
  }
  func.func @transform_4(%arg0: i32) -> (i32, i32) {
    %c0_i32 = arith.constant 0 : i32
    %c0_i32_0 = arith.constant 0 : i32
    %c0_i32_1 = arith.constant 0 : i32
    return %c0_i32, %c0_i32_0 : i32, i32
  }
  func.func @transform_5(%arg0: i32) -> (i32, i32) {
    %c0_i32 = arith.constant 0 : i32
    %c0_i32_0 = arith.constant 0 : i32
    return %arg0, %c0_i32 : i32, i32
  }
}

module attributes {stable_mosaic.version = 11 : i64} {
  func.func @_add_layernorm_kernel(%arg0: i32, %arg1: memref<16x32xf32, #tpu.memory_space<vmem>>, %arg2: memref<16x32xf32, #tpu.memory_space<vmem>>, %arg3: memref<1x32xf32, #tpu.memory_space<vmem>>, %arg4: memref<1x32xf32, #tpu.memory_space<vmem>>, %arg5: memref<16x32xf32, #tpu.memory_space<vmem>>) attributes {dimension_semantics = [#tpu.dimension_semantics<parallel>], iteration_bounds = array<i64: 1>, scalar_prefetch = 0 : i64, scratch_operands = 0 : i64, tpu.core_type = #tpu.core_type<tc>, window_params = [{transform_indices = @transform_0, window_bounds = array<i64: 16, 32>}, {transform_indices = @transform_1, window_bounds = array<i64: 16, 32>}, {pipeline_mode = #tpu.pipeline_mode<synchronous>, transform_indices = @transform_2, window_bounds = array<i64: 1, 32>}, {pipeline_mode = #tpu.pipeline_mode<synchronous>, transform_indices = @transform_3, window_bounds = array<i64: 1, 32>}, {transform_indices = @transform_4, window_bounds = array<i64: 16, 32>}]} {
    %c0 = arith.constant 0 : index
    %c0_0 = arith.constant 0 : index
    %0 = vector.load %arg1[%c0, %c0_0] : memref<16x32xf32, #tpu.memory_space<vmem>>, vector<16x32xf32>
    %c0_1 = arith.constant 0 : index
    %c0_2 = arith.constant 0 : index
    %1 = vector.load %arg2[%c0_1, %c0_2] : memref<16x32xf32, #tpu.memory_space<vmem>>, vector<16x32xf32>
    %2 = arith.addf %0, %1 : vector<16x32xf32>
    %cst = arith.constant dense<0.000000e+00> : vector<16xf32>
    %3 = vector.multi_reduction <add>, %2, %cst [1] : vector<16x32xf32> to vector<16xf32>
    %4 = vector.shape_cast %3 : vector<16xf32> to vector<16x1xf32>
    %cst_3 = arith.constant 3.200000e+01 : f32
    %5 = vector.broadcast %cst_3 : f32 to vector<16x1xf32>
    %6 = arith.divf %4, %5 : vector<16x1xf32>
    %7 = vector.broadcast %6 : vector<16x1xf32> to vector<16x32xf32>
    %8 = arith.subf %2, %7 : vector<16x32xf32>
    %9 = arith.mulf %8, %8 : vector<16x32xf32>
    %cst_4 = arith.constant dense<0.000000e+00> : vector<16xf32>
    %10 = vector.multi_reduction <add>, %9, %cst_4 [1] : vector<16x32xf32> to vector<16xf32>
    %11 = vector.shape_cast %10 : vector<16xf32> to vector<16x1xf32>
    %cst_5 = arith.constant 3.100000e+01 : f32
    %12 = vector.broadcast %cst_5 : f32 to vector<16x1xf32>
    %13 = arith.divf %11, %12 : vector<16x1xf32>
    %14 = math.sqrt %13 : vector<16x1xf32>
    %c0_6 = arith.constant 0 : index
    %c0_7 = arith.constant 0 : index
    %15 = vector.load %arg3[%c0_6, %c0_7] : memref<1x32xf32, #tpu.memory_space<vmem>>, vector<1x32xf32>
    %16 = vector.broadcast %15 : vector<1x32xf32> to vector<16x32xf32>
    %17 = arith.mulf %16, %8 : vector<16x32xf32>
    %cst_8 = arith.constant 1.000000e-10 : f32
    %18 = vector.broadcast %cst_8 : f32 to vector<16x1xf32>
    %19 = arith.addf %14, %18 : vector<16x1xf32>
    %20 = vector.broadcast %19 : vector<16x1xf32> to vector<16x32xf32>
    %21 = arith.divf %17, %20 : vector<16x32xf32>
    %c0_9 = arith.constant 0 : index
    %c0_10 = arith.constant 0 : index
    %22 = vector.load %arg4[%c0_9, %c0_10] : memref<1x32xf32, #tpu.memory_space<vmem>>, vector<1x32xf32>
    %23 = vector.broadcast %22 : vector<1x32xf32> to vector<16x32xf32>
    %24 = arith.addf %21, %23 : vector<16x32xf32>
    %c0_11 = arith.constant 0 : index
    %c0_12 = arith.constant 0 : index
    %25 = vector.load %arg5[%c0_11, %c0_12] : memref<16x32xf32, #tpu.memory_space<vmem>>, vector<16x32xf32>
    tpu.vector_store %arg5[%c0_11, %c0_12], %24 {strides = array<i32>} : memref<16x32xf32, #tpu.memory_space<vmem>>, vector<16x32xf32>,
    return
  }
  func.func @transform_0(%arg0: i32) -> (i32, i32) {
    %c0_i32 = arith.constant 0 : i32
    %c0_i32_0 = arith.constant 0 : i32
    return %arg0, %c0_i32 : i32, i32
  }
  func.func @transform_1(%arg0: i32) -> (i32, i32) {
    %c0_i32 = arith.constant 0 : i32
    %c0_i32_0 = arith.constant 0 : i32
    return %arg0, %c0_i32 : i32, i32
  }
  func.func @transform_2(%arg0: i32) -> (i32, i32) {
    %c0_i32 = arith.constant 0 : i32
    %c0_i32_0 = arith.constant 0 : i32
    %c0_i32_1 = arith.constant 0 : i32
    return %c0_i32, %c0_i32_0 : i32, i32
  }
  func.func @transform_3(%arg0: i32) -> (i32, i32) {
    %c0_i32 = arith.constant 0 : i32
    %c0_i32_0 = arith.constant 0 : i32
    %c0_i32_1 = arith.constant 0 : i32
    return %c0_i32, %c0_i32_0 : i32, i32
  }
  func.func @transform_4(%arg0: i32) -> (i32, i32) {
    %c0_i32 = arith.constant 0 : i32
    %c0_i32_0 = arith.constant 0 : i32
    return %arg0, %c0_i32 : i32, i32
  }
}

</mosaic_0001>

<bundles_post_ra>
// kernel: encoder_forward.15
= control target key start
LH: loop header
LB: loop body
LE: loop exit
PB: predicated region body
PF: predicated region fallthrough
CT: control target
= control target key end

     0   :  { %vm23_vm0 = vcmask 261120   ;;  %s155_s0 = inlined_call_operand.vmem [shape: f32[16,32], index: 0, kind: input, shape index: {}]   ;;  %s156_s1 = inlined_call_operand.vmem [shape: f32[16,32], index: 1, kind: input, shape index: {}]   ;;  %s157_s2 = inlined_call_operand.vmem [shape: f32[1,32], index: 2, kind: input, shape index: {}]   ;;  %s158_s3 = inlined_call_operand.vmem [shape: f32[1,32], index: 3, kind: input, shape index: {}]   ;;  %s159_s4 = inlined_call_operand.vmem [shape: f32[16,32], index: 4, kind: output, shape index: {}]  }
   0x1   :  { %v17_v0 = vld [vmem:[%s155_s0] sm:$0xff]  ;;  %v18_v2 = vld [vmem:[%s155_s0 + $0x8] sm:$0xff] }
   0x2   :  { %v19_v1 = vld [vmem:[%s156_s1] sm:$0xff]  ;;  %v20_v4 = vld [vmem:[%s156_s1 + $0x8] sm:$0xff] }
   0x3   :  { %v21_v3 = vadd.f32 %v19_v1, %v17_v0  ;;  %v22_v5 = vadd.f32 %v20_v4, %v18_v2  ;;  %v90_v34 = vld [vmem:[%s157_s2] ss:$0 sm:$0xff] }
   0x4   :  { %v91_v37 = vld [vmem:[%s158_s3] ss:$0 sm:$0xff] }
   0x5   :  { %v24_v6 = vsel %vm23_vm0, %v21_v3, 0.0  ;;  %v27_v7 = vsel %vm23_vm0, %v22_v5, 0.0 }
   0x6   :  { %25 = vadd.xlane.f32.xlu0 %v24_v6 }
   0xa   :  { %28 = vadd.xlane.f32.xlu0 %v27_v7 }
  0x93   :  { %v26_v8 = vpop.xlane.xlu0 %25 }
  0x94   :  { %v31_v9 = vmul.f32 0.03125, %v26_v8 }
  0x96   :  { %v33_v10 = vsub.f32 %v21_v3, %v31_v9 }
  0x97   :  { %v29_v11 = vpop.xlane.xlu0 %28 }
  0x98   :  { %v32_v12 = vmul.f32 0.03125, %v29_v11  ;;  %v35_v13 = vmul.f32 %v33_v10, %v33_v10  ;;  %v67_v35 = vmul.f32 %v90_v34, %v33_v10 }
  0x9a   :  { %v34_v14 = vsub.f32 %v22_v5, %v32_v12  ;;  %v37_v15 = vsel %vm23_vm0, %v35_v13, 0.0 }
  0x9b   :  { %38 = vadd.xlane.f32.xlu1 %v37_v15 }
  0x9c   :  { %v36_v16 = vmul.f32 %v34_v14, %v34_v14  ;;  %v68_v39 = vmul.f32 %v90_v34, %v34_v14 }
  0x9e   :  { %v40_v17 = vsel %vm23_vm0, %v36_v16, 0.0 }
  0x9f   :  { %41 = vadd.xlane.f32.xlu1 %v40_v17 }
 0x128   :  { %v39_v18 = vpop.xlane.xlu1 %38 }
 0x129   :  { %v44_v19 = vmul.f32 0.032258064, %v39_v18 }
 0x12b   :  { %92 = vrsqrt.f32 %v44_v19  ;;  %vm48_vm1 = vcmp.eq.f32.partialorder %v44_v19, inf  ;;  %v51_v24 = vand.u32 2147483648, %v44_v19  ;;  %vm50_vm2 = vcmp.eq.f32.partialorder %v44_v19, 0.0 }
 0x12c   :  { %v42_v20 = vpop.xlane.xlu1 %41 }
 0x12d   :  { %v45_v21 = vmul.f32 0.032258064, %v42_v20 }
 0x12f   :  { %94 = vrsqrt.f32 %v45_v21  ;;  %vm55_vm3 = vcmp.eq.f32.partialorder %v45_v21, inf  ;;  %v58_v30 = vand.u32 2147483648, %v45_v21  ;;  %vm57_vm4 = vcmp.eq.f32.partialorder %v45_v21, 0.0 }
 0x135   :  { %v93_v22 = vpop.eup %92 }
 0x136   :  { %v47_v23 = vmul.f32 %v93_v22, %v44_v19 }
 0x138   :  { %v49_v25 = vsel %vm48_vm1, %v44_v19, %v47_v23 }
 0x139   :  { %v95_v26 = vpop.eup %94  ;;  %v52_v27 = vsel %vm50_vm2, %v51_v24, %v49_v25 }
 0x13a   :  { %v69_v28 = vadd.f32 1e-10, %v52_v27  ;;  %v54_v29 = vmul.f32 %v95_v26, %v45_v21 }
 0x13c   :  { %96 = vrcp.f32 %v69_v28  ;;  %v56_v31 = vsel %vm55_vm3, %v45_v21, %v54_v29 }
 0x13d   :  { %v59_v32 = vsel %vm57_vm4, %v58_v30, %v56_v31 }
 0x13e   :  { %v70_v33 = vadd.f32 1e-10, %v59_v32 }
 0x140   :  { %98 = vrcp.f32 %v70_v33 }
 0x146   :  { %v97_v36 = vpop.eup %96 }
 0x147   :  { %v72_v38 = vmul.f32 %v97_v36, %v67_v35 }
 0x149   :  { %v82_v40 = vadd.f32 %v91_v37, %v72_v38 }
 0x14a   :  { %v99_v41 = vpop.eup %98 }
 0x14b   :  { %84 = vst.msk [vmem:[%s159_s4] sm:$0xff] %vm23_vm0, %v82_v40  ;;  %v74_v42 = vmul.f32 %v99_v41, %v68_v39 }
 0x14d   :  { %v83_v43 = vadd.f32 %v91_v37, %v74_v42 }
 0x14f   :  { %85 = vst.msk [vmem:[%s159_s4 + $0x8] sm:$0xff] %vm23_vm0, %v83_v43 }

// kernel: encoder_forward.14
= control target key start
LH: loop header
LB: loop body
LE: loop exit
PB: predicated region body
PF: predicated region fallthrough
CT: control target
= control target key end

     0   :  { %vm27_vm0 = vcmask 261120   ;;  %s794_s1 = inlined_call_operand.vmem [shape: f32[32,32], index: 1, kind: input, shape index: {}]   ;;  %s795_s0 = inlined_call_operand.vmem [shape: f32[16,32], index: 0, kind: input, shape index: {}]   ;;  %s796_s2 = inlined_call_operand.vmem [shape: f32[1,32], index: 2, kind: input, shape index: {}]   ;;  %s797_s3 = inlined_call_operand.vmem [shape: f32[16,32], index: 3, kind: output, shape index: {}]  }
   0x1   :  { %v16_v0 = vld [vmem:[%s794_s1] sm:$0xff]  ;;  %v17_v1 = vld [vmem:[%s794_s1 + $0x8] sm:$0xff]  ;;  %v18_v2 = vld [vmem:[%s794_s1 + $0x10] sm:$0xff] }
   0x2   :  { %v35_v3 = vand.u32 4294901760, %v16_v0  ;;  %v38_v4 = vand.u32 4294901760, %v17_v1  ;;  %v19_v5 = vld [vmem:[%s794_s1 + $0x18] sm:$0xff]  ;;  %v41_v6 = vand.u32 4294901760, %v18_v2  ;;  %v14_v7 = vld [vmem:[%s795_s0] sm:$0xff]  ;;  %v15_v8 = vld [vmem:[%s795_s0 + $0x8] sm:$0xff] }
   0x3   :  { %v44_v9 = vand.u32 4294901760, %v19_v5  ;;  %v29_v10 = vsel %vm27_vm0, %v14_v7, 0  ;;  %v32_v11 = vsel %vm27_vm0, %v15_v8, 0  ;;  %v568_v46 = vld [vmem:[%s796_s2] ss:$0 sm:$0xff] }
   0x4   :  { %v671_v12 = vpack.c.bf16 %v38_v4, %v35_v3  ;;  %v771_v13 = vand.u32 4294901760, %v29_v10  ;;  %v773_v14 = vand.u32 4294901760, %v32_v11  ;;  %v125_v15 = vsub.f32 %v16_v0, %v35_v3 }
   0x5   :  { %v675_v16 = vpack.c.bf16 %v44_v9, %v41_v6  ;;  %v132_v17 = vsub.f32 %v17_v1, %v38_v4  ;;  %v139_v18 = vsub.f32 %v18_v2, %v41_v6  ;;  %v146_v19 = vsub.f32 %v19_v5, %v44_v9 }
   0x6   :  { %672 = vmatprep.subr.bf16.mxu1 %v671_v12  ;;  %696 = vmatprep.subr.bf16.mxu0 %v671_v12  ;;  %v104_v20 = vsub.f32 %v29_v10, %v771_v13  ;;  %v114_v21 = vsub.f32 %v32_v11, %v773_v14  ;;  %v126_v22 = vand.u32 4294901760, %v125_v15 }
   0x7   :  { %674 = vmatpush3.bf16.msra.mxu1 %v671_v12  ;;  %698 = vmatpush3.bf16.msra.mxu0 %v671_v12  ;;  %v133_v23 = vand.u32 4294901760, %v132_v17  ;;  %v140_v24 = vand.u32 4294901760, %v139_v18  ;;  %v147_v25 = vand.u32 4294901760, %v146_v19  ;;  %v687_v44 = vpack.c.bf16 %v132_v17, %v125_v15 }
   0x8   :  { %676 = vmatprep.subr.bf16.mxu1 %v675_v16  ;;  %700 = vmatprep.subr.bf16.mxu0 %v675_v16  ;;  %v105_v26 = vand.u32 4294901760, %v104_v20  ;;  %v115_v27 = vand.u32 4294901760, %v114_v21  ;;  %v127_v28 = vsub.f32 %v125_v15, %v126_v22  ;;  %v691_v45 = vpack.c.bf16 %v146_v19, %v139_v18 }
   0x9   :  { %v134_v29 = vsub.f32 %v132_v17, %v133_v23  ;;  %v703_v30 = vpack.c.bf16 %v133_v23, %v126_v22  ;;  %v141_v31 = vsub.f32 %v139_v18, %v140_v24  ;;  %v148_v32 = vsub.f32 %v146_v19, %v147_v25 }
   0xa   :  { %v106_v33 = vsub.f32 %v104_v20, %v105_v26  ;;  %646 = vmatprep.mubr.f32.mxu0 %v105_v26  ;;  %v116_v34 = vsub.f32 %v114_v21, %v115_v27  ;;  %v128_v35 = vand.u32 4294901760, %v127_v28  ;;  %v707_v43 = vpack.c.bf16 %v147_v25, %v140_v24 }
   0xb   :  { %678 = vmatpush3.bf16.msra.mxu1 %v675_v16  ;;  %702 = vmatpush3.bf16.msra.mxu0 %v675_v16  ;;  %v135_v36 = vand.u32 4294901760, %v134_v29  ;;  %v142_v37 = vand.u32 4294901760, %v141_v31  ;;  %v149_v38 = vand.u32 4294901760, %v148_v32 }
   0xc   :  { %v107_v39 = vand.u32 4294901760, %v106_v33  ;;  %v117_v40 = vand.u32 4294901760, %v116_v34  ;;  %704 = vmatprep.subr.bf16.mxu0 %v703_v30 }
   0xd   :  { %v679_v41 = vpack.c.bf16 %v135_v36, %v128_v35  ;;  %v683_v42 = vpack.c.bf16 %v149_v38, %v142_v37 }
   0xe   :  { %613 = vmatprep.mubr.f32.mxu1 %v107_v39  ;;  %647 = vmatmul.mubr.f32.vlgmr.msra.gmra.mrb[0].mxu0 %v115_v27 }
   0xf   :  { %614 = vmatmul.mubr.f32.vlgmr.msra.gmra.mrb[0].mxu1 %v117_v40  ;;  %680 = vmatprep.subr.bf16.mxu1 %v679_v41 }
  0x10   :  { %682 = vmatpush3.bf16.msra.mxu1 %v679_v41  ;;  %706 = vmatpush3.bf16.msra.mxu0 %v703_v30 }
  0x11   :  { %684 = vmatprep.subr.bf16.mxu1 %v683_v42  ;;  %708 = vmatprep.subr.bf16.mxu0 %v707_v43 }
  0x12   :  { %624 = vmatprep.mubr.f32.mxu1 %v771_v13  ;;  %657 = vmatprep.mubr.f32.mxu0 %v771_v13 }
  0x14   :  { %686 = vmatpush3.bf16.msra.mxu1 %v683_v42  ;;  %710 = vmatpush3.bf16.msra.mxu0 %v707_v43 }
  0x15   :  { %688 = vmatprep.subr.bf16.mxu1 %v687_v44  ;;  %712 = vmatprep.subr.bf16.mxu0 %v671_v12 }
  0x17   :  { %625 = vmatmul.mubr.f32.vlgmr.msra.gmra.mrb[0].mxu1 %v773_v14  ;;  %658 = vmatmul.mubr.f32.vlgmr.msra.gmra.mrb[0].mxu0 %v773_v14 }
  0x18   :  { %690 = vmatpush3.bf16.msra.mxu1 %v687_v44  ;;  %714 = vmatpush3.bf16.msra.mxu0 %v671_v12 }
  0x19   :  { %692 = vmatprep.subr.bf16.mxu1 %v691_v45  ;;  %716 = vmatprep.subr.bf16.mxu0 %v675_v16 }
  0x1a   :  { %635 = vmatprep.mubr.f32.mxu1 %v104_v20  ;;  %668 = vmatprep.mubr.f32.mxu0 %v771_v13 }
  0x1c   :  { %694 = vmatpush3.bf16.msra.mxu1 %v691_v45  ;;  %718 = vmatpush3.bf16.msra.mxu0 %v675_v16 }
  0x1f   :  { %636 = vmatmul.mubr.f32.vlgmr.msra.gmra.mrb[0].mxu1 %v114_v21  ;;  %669 = vmatmul.mubr.f32.vlgmr.msra.gmra.mrb[0].mxu0 %v773_v14 }
  0xf2   :  { %v637_v47 = vpop.f32.mrb[0].mxu1  ;;  %v670_v48 = vpop.f32.mrb[0].mxu0 }
  0xf3   :  { %v719_v49 = vadd.f32 %v637_v47, %v568_v46  ;;  %v296_v50 = vpop.f32.mrb[1].mxu1  ;;  %v552_v51 = vpop.f32.mrb[1].mxu0 }
  0xf4   :  { %v721_v52 = vadd.f32 %v568_v46, %v296_v50 }
  0xf5   :  { %v720_v53 = vadd.f32 %v719_v49, %v670_v48 }
  0xf6   :  { %v722_v54 = vadd.f32 %v721_v52, %v552_v51 }
  0xf7   :  { %563 = vst.msk [vmem:[%s797_s3 + $0x8] sm:$0xff] %vm27_vm0, %v720_v53 }
  0xf8   :  { %562 = vst.msk [vmem:[%s797_s3] sm:$0xff] %vm27_vm0, %v722_v54 }

// kernel: encoder_forward.13
= control target key start
LH: loop header
LB: loop body
LE: loop exit
PB: predicated region body
PF: predicated region fallthrough
CT: control target
= control target key end

     0   :  { %s1597_s15 = smov 0   ;;  %s1599_s16 = smov 0   ;;  %s1709_s0 = inlined_call_operand.vmem [shape: f32[2,4,8,8], index: 0, kind: input, shape index: {}]   ;;  %s1710_s1 = inlined_call_operand.vmem [shape: f32[2,4,8,8], index: 1, kind: input, shape index: {}]   ;;  %s1711_s2 = inlined_call_operand.vmem [shape: f32[2,4,8,8], index: 2, kind: input, shape index: {}]   ;;  %s1712_s3 = inlined_call_operand.vmem [shape: f32[2,1,1,8], index: 3, kind: input, shape index: {}]   ;;  %s1713_s4 = inlined_call_operand.vmem [shape: f32[2,4,8,8], index: 4, kind: output, shape index: {}]  }
   0x1   :  { %s1601_s17 = smov 0   ;;  %s1603_s18 = smov 0  }
   0x2   :  { %s1605_s19 = smov 0  }
   0x3 LB: > { %s23_s20 = sadd.s32 1, %s1559_s17  ;;  %s26_s21 = sadd.s32 1, %s1563_s18  ;;  %s1567_s19 = sphi %s1605_s19, %s14_s19   ;;  %s1563_s18 = sphi %s1603_s18, %s1717_s18   ;;  %s1559_s17 = sphi %s1601_s17, %s1716_s17   ;;  %s1555_s16 = sphi %s1599_s16, %s1715_s16   ;;  %s1551_s15 = sphi %s1597_s15, %s1714_s15  }
   0x4   : > { %p24_p0 = scmp.ge.s32.totalorder %s23_s20, 4  ;;  %p1367_p1 = scmp.ge.s32.totalorder %s1567_s19, 1 }
   0x5   : > { %p219_p2 = scmp.lt.s32.totalorder %s1567_s19, 9 }
   0x6   : > { %s1719_s20 = smov (%p24_p0, %s23_s20), 0  ;;  %s1721_s21 = smov (!%p24_p0, %s26_s21), %s1563_s18 }
   0x7   : > { %p220_p3 = pnand %p1367_p1, %p219_p2  ;;  %p28_p4 = scmp.ge.s32.totalorder %s1721_s21, 2 }
   0x8   : > { %p270_p5 = scmp.lt.s32.totalorder (!%p220_p3), %s1555_s16, 1  ;;  %p272_p6 = scmp.lt.s32.totalorder (!%p220_p3), %s1551_s15, 3  ;;  %v1569_v0 = vmov (!%p220_p3), 0.0   ;;  %vm1570_vm0 = vmmov (!%p220_p3), 0   ;;  %vm309_vm1 = vcmask (!%p220_p3), 64512   ;;  %v765_v15 = vlaneseq (!%p220_p3) }
   0x9   : > { %s1723_s21 = smov (%p28_p4, %s1721_s21), 0  ;;  %223 = sbr.rel (%p220_p3) target bundleno = 867 (0x363), region = 36 }
   0xa   : > { %1402 = vmatprep.subr.mxu0 (!%p220_p3), %v1569_v0  ;;  %1404 = vmatprep.mubr.msk.f32.mxu0 (!%p220_p3), %vm1570_vm0, %v1569_v0  ;;  %v766_v17 = vshrl.u32 (!%p220_p3), %v765_v15, 7  ;;  %v1571_v19 = vmov (!%p220_p3), 0  }
   0xb   : > { %1432 = vmatprep.subr.mxu1 (!%p220_p3), %v1569_v0  ;;  %1434 = vmatprep.mubr.msk.f32.mxu1 (!%p220_p3), %vm1570_vm0, %v1569_v0 }
   0xc   : > { %v767_v18 = vsub.s32 (!%p220_p3), 0, %v766_v17 }
  0x10   : > { %s1725_s16 = smov (!%p270_p5, %s1555_s16), 1  ;;  %s1727_s15 = smov (!%p272_p6, %s1551_s15), 3 }
  0x11   : > { %s1368_s22 = sshll.u32 %s1725_s16, 2  ;;  %s296_s7 = scalar_lea.vmem %s1712_s3, %s1725_s16 }
  0x12   : > { %s275_s23 = sadd.s32 %s1368_s22, %s1727_s15  ;;  %v308_v16 = vld [vmem:[%s296_s7] sm:$0x1] }
  0x13   : > { %s1636_s24 = sshll.u32 %s275_s23, 3  ;;  %vm763_vm2 = vcmp.eq.f32.partialorder %v308_v16, 0.0 }
  0x14   : > { %s285_s27 = scalar_lea.vmem %s1710_s1, %s1636_s24  ;;  %s277_s30 = scalar_lea.vmem %s1709_s0, %s1636_s24  ;;  %v764_v20 = vsel %vm763_vm2, 1, %v1571_v19 }
  0x15   : > { %v306_v1 = vld [vmem:[%s285_s27] sm:$0xff]  ;;  %v768_v21 = vrot.slane %v764_v20, %v767_v18  ;;  %s293_s10 = scalar_lea.vmem %s1711_s2, %s1636_s24  ;;  %s304_s13 = scalar_lea.vmem %s1713_s4, %s1636_s24 }
  0x16   : > { %v305_v2 = vld [vmem:[%s277_s30] sm:$0xff]  ;;  %v314_v3 = vsel %vm309_vm1, %v306_v1, 0 }
  0x17   : > { %v311_v4 = vsel %vm309_vm1, %v305_v2, 0  ;;  %v317_v5 = vand.u32 4294901760, %v314_v3  ;;  %vm769_vm3 = vcmp.eq.s32.totalorder %v768_v21, 1  ;;  %v307_v32 = vld [vmem:[%s293_s10] sm:$0xff] }
  0x18   : > { %v382_v6 = vand.u32 4294901760, %v311_v4  ;;  %v786_v33 = vand.u32 4294901760, %v307_v32 }
  0x19   : > { %1403 = vmatpush3.xpose.msra.mxu0 %v317_v5  ;;  %v394_v7 = vsub.f32 %v314_v3, %v317_v5 }
  0x1a   : > { %v383_v8 = vsub.f32 %v311_v4, %v382_v6  ;;  %1407 = vmatprep.subr.mxu0 %v1569_v0  ;;  %1433 = vmatpush3.msra.mxu1 %v786_v33  ;;  %v863_v35 = vsub.f32 %v307_v32, %v786_v33 }
  0x1b   : > { %v395_v10 = vand.u32 4294901760, %v394_v7  ;;  %1437 = vmatprep.subr.mxu1 %v1569_v0 }
  0x1c   : > { %v384_v9 = vand.u32 4294901760, %v383_v8  ;;  %v864_v39 = vand.u32 4294901760, %v863_v35 }
  0x1d   : > { %v396_v12 = vsub.f32 %v394_v7, %v395_v10 }
  0x1e   : > { %v385_v11 = vsub.f32 %v383_v8, %v384_v9  ;;  %v865_v42 = vsub.f32 %v863_v35, %v864_v39 }
  0x1f   : > { %v397_v14 = vand.u32 4294901760, %v396_v12 }
  0x20   : > { %v386_v13 = vand.u32 4294901760, %v385_v11  ;;  %v866_v45 = vand.u32 4294901760, %v865_v42 }
  0x22   : > { %1405 = vmatmul.mubr.f32.vlgmr.msra.gmra.mrb[0].mxu0 %v386_v13 }
  0x23   : > { %1408 = vmatpush3.xpose.msra.mxu0 %v397_v14  ;;  %1409 = vmatprep.mubr.msk.f32.mxu0 %vm1570_vm0, %v1569_v0 }
  0x24   : > { %1412 = vmatprep.subr.mxu0 %v1569_v0 }
  0x2a   : > { %1410 = vmatmul.mubr.f32.vlgmr.msra.gmra.mrb[0].mxu0 %v382_v6 }
  0x2b   : > { %1413 = vmatpush3.xpose.msra.mxu0 %v394_v7  ;;  %1414 = vmatprep.mubr.msk.f32.mxu0 %vm1570_vm0, %v1569_v0 }
  0x2c   : > { %1417 = vmatprep.subr.mxu0 %v1569_v0 }
  0x32   : > { %1415 = vmatmul.mubr.f32.vlgmr.msra.gmra.mrb[0].mxu0 %v383_v8 }
  0x33   : > { %1418 = vmatpush3.xpose.msra.mxu0 %v317_v5  ;;  %1419 = vmatprep.mubr.msk.f32.mxu0 %vm1570_vm0, %v1569_v0 }
  0x34   : > { %1422 = vmatprep.subr.mxu0 %v1569_v0 }
  0x3a   : > { %1420 = vmatmul.mubr.f32.vlgmr.msra.gmra.mrb[0].mxu0 %v384_v9 }
  0x3b   : > { %1423 = vmatpush3.xpose.msra.mxu0 %v395_v10  ;;  %1424 = vmatprep.mubr.msk.f32.mxu0 %vm1570_vm0, %v1569_v0 }
  0x3c   : > { %1427 = vmatprep.subr.mxu0 %v1569_v0 }
  0x42   : > { %1425 = vmatmul.mubr.f32.vlgmr.msra.gmra.mrb[0].mxu0 %v382_v6 }
  0x43   : > { %1428 = vmatpush3.xpose.msra.mxu0 %v317_v5  ;;  %1429 = vmatprep.mubr.msk.f32.mxu0 %vm1570_vm0, %v1569_v0 }
  0x4a   : > { %1430 = vmatmul.mubr.f32.vlgmr.msra.gmra.mrb[0].mxu0 %v382_v6 }
 0x11d   : > { %v758_v22 = vpop.f32.mrb[0].mxu0 }
 0x11e   : > { %v762_v23 = vmul.f32 0.35355338, %v758_v22  ;;  %v1431_v24 = vpop.f32.mrb[1].mxu0 }
 0x120   : > { %v770_v25 = vsel %vm769_vm3, -inf, %v762_v23 }
 0x121   : > { %v771_v26 = vsel %vm309_vm1, %v770_v25, -inf }
 0x122   : > { %772 = vmax.xlane.f32.xlu0 %v771_v26 }
 0x1af   : > { %v773_v27 = vpop.xlane.xlu0 %772 }
 0x1b0   : > { %v774_v28 = vsub.f32 %v770_v25, %v773_v27 }
 0x1b2   : > { %v775_v29 = vmul.f32 1.442695, %v774_v28 }
 0x1b4   : > { %1525 = vpow2.f32 %v775_v29 }
 0x1be   : > { %v1526_v30 = vpop.eup %1525 }
 0x1bf   : > { %v777_v31 = vsel %vm309_vm1, %v1526_v30, 0.0 }
 0x1c0   : > { %778 = vadd.xlane.f32.xlu0 %v777_v31 }
 0x24d   : > { %v779_v34 = vpop.xlane.xlu0 %778 }
 0x24e   : > { %1527 = vrcp.f32 %v779_v34 }
 0x258   : > { %v1528_v36 = vpop.eup %1527 }
 0x259   : > { %v781_v37 = vmul.f32 %v1528_v36, %v1526_v30 }
 0x25b   : > { %v783_v38 = vsel %vm309_vm1, %v781_v37, 0 }
 0x25c   : > { %v851_v40 = vand.u32 4294901760, %v783_v38 }
 0x25e   : > { %v852_v41 = vsub.f32 %v783_v38, %v851_v40 }
 0x260   : > { %v853_v43 = vand.u32 4294901760, %v852_v41 }
 0x262   : > { %v854_v44 = vsub.f32 %v852_v41, %v853_v43 }
 0x264   : > { %v855_v46 = vand.u32 4294901760, %v854_v44 }
 0x266   : > { %1435 = vmatmul.mubr.f32.vlgmr.msra.gmra.mrb[0].mxu1 %v855_v46 }
 0x267   : > { %1438 = vmatpush3.msra.mxu1 %v866_v45  ;;  %1439 = vmatprep.mubr.msk.f32.mxu1 %vm1570_vm0, %v1569_v0 }
 0x268   : > { %1442 = vmatprep.subr.mxu1 %v1569_v0 }
 0x26e   : > { %1440 = vmatmul.mubr.f32.vlgmr.msra.gmra.mrb[0].mxu1 %v851_v40 }
 0x26f   : > { %1443 = vmatpush3.msra.mxu1 %v863_v35  ;;  %1444 = vmatprep.mubr.msk.f32.mxu1 %vm1570_vm0, %v1569_v0 }
 0x270   : > { %1447 = vmatprep.subr.mxu1 %v1569_v0 }
 0x276   : > { %1445 = vmatmul.mubr.f32.vlgmr.msra.gmra.mrb[0].mxu1 %v852_v41 }
 0x277   : > { %1448 = vmatpush3.msra.mxu1 %v786_v33  ;;  %1449 = vmatprep.mubr.msk.f32.mxu1 %vm1570_vm0, %v1569_v0 }
 0x278   : > { %1452 = vmatprep.subr.mxu1 %v1569_v0 }
 0x27e   : > { %1450 = vmatmul.mubr.f32.vlgmr.msra.gmra.mrb[0].mxu1 %v853_v43 }
 0x27f   : > { %1453 = vmatpush3.msra.mxu1 %v864_v39  ;;  %1454 = vmatprep.mubr.msk.f32.mxu1 %vm1570_vm0, %v1569_v0 }
 0x280   : > { %1457 = vmatprep.subr.mxu1 %v1569_v0 }
 0x286   : > { %1455 = vmatmul.mubr.f32.vlgmr.msra.gmra.mrb[0].mxu1 %v851_v40 }
 0x287   : > { %1458 = vmatpush3.msra.mxu1 %v786_v33  ;;  %1459 = vmatprep.mubr.msk.f32.mxu1 %vm1570_vm0, %v1569_v0 }
 0x28e   : > { %1460 = vmatmul.mubr.f32.vlgmr.msra.gmra.mrb[0].mxu1 %v851_v40 }
 0x361   : > { %v1227_v47 = vpop.f32.mrb[0].mxu1 }
 0x362   : > { %1231 = vst.msk [vmem:[%s304_s13] sm:$0xff] %vm309_vm1, %v1227_v47  ;;  %v1461_v48 = vpop.f32.mrb[1].mxu1 }
 0x363 PF: > { %s14_s19 = sadd.s32 1, %s1567_s19   ;;  %s1714_s15 = smov %s1559_s17 }
 0x364   : > { %p11_p7 = scmp.ge.s32.totalorder %s14_s19, 10   ;;  %s1715_s16 = smov %s1563_s18 }
 0x365   : > { %s1716_s17 = smov %s1719_s20  ;;  %s1717_s18 = smov %s1723_s21 }
 0x366   :  { %13 = sbr.rel (!%p11_p7) target bundleno = 3 (0x3), region = 75 }

// kernel: encoder_forward.12
= control target key start
LH: loop header
LB: loop body
LE: loop exit
PB: predicated region body
PF: predicated region fallthrough
CT: control target
= control target key end

     0   :  { %vm17_vm0 = vcmask 261120   ;;  %vm552_vm1 = vcmask 785408   ;;  %s770_s1 = inlined_call_operand.vmem [shape: f32[32,96], index: 1, kind: input, shape index: {}]   ;;  %s771_s0 = inlined_call_operand.vmem [shape: f32[16,32], index: 0, kind: input, shape index: {}]   ;;  %s772_s2 = inlined_call_operand.vmem [shape: f32[16,96], index: 2, kind: output, shape index: {}]  }
   0x1   :  { %v13_v0 = vld [vmem:[%s770_s1] sm:$0xff]  ;;  %v14_v1 = vld [vmem:[%s770_s1 + $0x8] sm:$0xff]  ;;  %v15_v2 = vld [vmem:[%s770_s1 + $0x10] sm:$0xff] }
   0x2   :  { %v25_v3 = vand.u32 4294901760, %v13_v0  ;;  %v28_v4 = vand.u32 4294901760, %v14_v1  ;;  %v16_v5 = vld [vmem:[%s770_s1 + $0x18] sm:$0xff]  ;;  %v31_v6 = vand.u32 4294901760, %v15_v2  ;;  %v11_v7 = vld [vmem:[%s771_s0] sm:$0xff]  ;;  %v12_v8 = vld [vmem:[%s771_s0 + $0x8] sm:$0xff] }
   0x3   :  { %v34_v9 = vand.u32 4294901760, %v16_v5  ;;  %v19_v10 = vsel %vm17_vm0, %v11_v7, 0  ;;  %v22_v11 = vsel %vm17_vm0, %v12_v8, 0 }
   0x4   :  { %v661_v12 = vpack.c.bf16 %v28_v4, %v25_v3  ;;  %v752_v13 = vand.u32 4294901760, %v19_v10  ;;  %v754_v14 = vand.u32 4294901760, %v22_v11  ;;  %v115_v15 = vsub.f32 %v13_v0, %v25_v3 }
   0x5   :  { %v665_v16 = vpack.c.bf16 %v34_v9, %v31_v6  ;;  %v122_v17 = vsub.f32 %v14_v1, %v28_v4  ;;  %v129_v18 = vsub.f32 %v15_v2, %v31_v6  ;;  %v136_v19 = vsub.f32 %v16_v5, %v34_v9 }
   0x6   :  { %662 = vmatprep.subr.bf16.mxu1 %v661_v12  ;;  %686 = vmatprep.subr.bf16.mxu0 %v661_v12  ;;  %v94_v20 = vsub.f32 %v19_v10, %v752_v13  ;;  %v104_v21 = vsub.f32 %v22_v11, %v754_v14  ;;  %v116_v22 = vand.u32 4294901760, %v115_v15 }
   0x7   :  { %664 = vmatpush3.bf16.msra.mxu1 %v661_v12  ;;  %688 = vmatpush3.bf16.msra.mxu0 %v661_v12  ;;  %v123_v23 = vand.u32 4294901760, %v122_v17  ;;  %v130_v24 = vand.u32 4294901760, %v129_v18  ;;  %v137_v25 = vand.u32 4294901760, %v136_v19  ;;  %v677_v44 = vpack.c.bf16 %v122_v17, %v115_v15 }
   0x8   :  { %666 = vmatprep.subr.bf16.mxu1 %v665_v16  ;;  %690 = vmatprep.subr.bf16.mxu0 %v665_v16  ;;  %v95_v26 = vand.u32 4294901760, %v94_v20  ;;  %v105_v27 = vand.u32 4294901760, %v104_v21  ;;  %v117_v28 = vsub.f32 %v115_v15, %v116_v22  ;;  %v681_v45 = vpack.c.bf16 %v136_v19, %v129_v18 }
   0x9   :  { %v124_v29 = vsub.f32 %v122_v17, %v123_v23  ;;  %v693_v30 = vpack.c.bf16 %v123_v23, %v116_v22  ;;  %v131_v31 = vsub.f32 %v129_v18, %v130_v24  ;;  %v138_v32 = vsub.f32 %v136_v19, %v137_v25 }
   0xa   :  { %v96_v33 = vsub.f32 %v94_v20, %v95_v26  ;;  %636 = vmatprep.mubr.f32.mxu0 %v95_v26  ;;  %v106_v34 = vsub.f32 %v104_v21, %v105_v27  ;;  %v118_v35 = vand.u32 4294901760, %v117_v28  ;;  %v697_v43 = vpack.c.bf16 %v137_v25, %v130_v24 }
   0xb   :  { %668 = vmatpush3.bf16.msra.mxu1 %v665_v16  ;;  %692 = vmatpush3.bf16.msra.mxu0 %v665_v16  ;;  %v125_v36 = vand.u32 4294901760, %v124_v29  ;;  %v132_v37 = vand.u32 4294901760, %v131_v31  ;;  %v139_v38 = vand.u32 4294901760, %v138_v32 }
   0xc   :  { %v97_v39 = vand.u32 4294901760, %v96_v33  ;;  %v107_v40 = vand.u32 4294901760, %v106_v34  ;;  %694 = vmatprep.subr.bf16.mxu0 %v693_v30 }
   0xd   :  { %v669_v41 = vpack.c.bf16 %v125_v36, %v118_v35  ;;  %v673_v42 = vpack.c.bf16 %v139_v38, %v132_v37 }
   0xe   :  { %603 = vmatprep.mubr.f32.mxu1 %v97_v39  ;;  %637 = vmatmul.mubr.f32.vlgmr.msra.gmra.mrb[0].mxu0 %v105_v27 }
   0xf   :  { %604 = vmatmul.mubr.f32.vlgmr.msra.gmra.mrb[0].mxu1 %v107_v40  ;;  %670 = vmatprep.subr.bf16.mxu1 %v669_v41 }
  0x10   :  { %672 = vmatpush3.bf16.msra.mxu1 %v669_v41  ;;  %696 = vmatpush3.bf16.msra.mxu0 %v693_v30 }
  0x11   :  { %674 = vmatprep.subr.bf16.mxu1 %v673_v42  ;;  %698 = vmatprep.subr.bf16.mxu0 %v697_v43 }
  0x12   :  { %614 = vmatprep.mubr.f32.mxu1 %v752_v13  ;;  %647 = vmatprep.mubr.f32.mxu0 %v752_v13 }
  0x14   :  { %676 = vmatpush3.bf16.msra.mxu1 %v673_v42  ;;  %700 = vmatpush3.bf16.msra.mxu0 %v697_v43 }
  0x15   :  { %678 = vmatprep.subr.bf16.mxu1 %v677_v44  ;;  %702 = vmatprep.subr.bf16.mxu0 %v661_v12 }
  0x17   :  { %615 = vmatmul.mubr.f32.vlgmr.msra.gmra.mrb[0].mxu1 %v754_v14  ;;  %648 = vmatmul.mubr.f32.vlgmr.msra.gmra.mrb[0].mxu0 %v754_v14 }
  0x18   :  { %680 = vmatpush3.bf16.msra.mxu1 %v677_v44  ;;  %704 = vmatpush3.bf16.msra.mxu0 %v661_v12 }
  0x19   :  { %682 = vmatprep.subr.bf16.mxu1 %v681_v45  ;;  %706 = vmatprep.subr.bf16.mxu0 %v665_v16 }
  0x1a   :  { %625 = vmatprep.mubr.f32.mxu1 %v94_v20  ;;  %658 = vmatprep.mubr.f32.mxu0 %v752_v13 }
  0x1c   :  { %684 = vmatpush3.bf16.msra.mxu1 %v681_v45  ;;  %708 = vmatpush3.bf16.msra.mxu0 %v665_v16 }
  0x1f   :  { %626 = vmatmul.mubr.f32.vlgmr.msra.gmra.mrb[0].mxu1 %v104_v21  ;;  %659 = vmatmul.mubr.f32.vlgmr.msra.gmra.mrb[0].mxu0 %v754_v14 }
  0xf2   :  { %v627_v46 = vpop.f32.mrb[0].mxu1  ;;  %v660_v47 = vpop.f32.mrb[0].mxu0 }
  0xf3   :  { %v709_v48 = vadd.f32 %v660_v47, %v627_v46  ;;  %v286_v49 = vpop.f32.mrb[1].mxu1  ;;  %v542_v50 = vpop.f32.mrb[1].mxu0 }
  0xf4   :  { %v710_v51 = vadd.f32 %v542_v50, %v286_v49 }
  0xf5   :  { %554 = vst.msk [vmem:[%s772_s2 + $0x8] sm:$0xff] %vm552_vm1, %v709_v48 }
  0xf6   :  { %553 = vst.msk [vmem:[%s772_s2] sm:$0xff] %vm552_vm1, %v710_v51 }

// kernel: encoder_forward.23
= control target key start
LH: loop header
LB: loop body
LE: loop exit
PB: predicated region body
PF: predicated region fallthrough
CT: control target
= control target key end

     0   :  { %vm24_vm0 = vcmask 261120   ;;  %s204_s0 = inlined_call_operand.vmem [shape: f32[16,32], index: 0, kind: input, shape index: {}]   ;;  %s205_s1 = inlined_call_operand.vmem [shape: f32[16,32], index: 1, kind: input, shape index: {}]   ;;  %s206_s2 = inlined_call_operand.vmem [shape: f32[1,32], index: 2, kind: input, shape index: {}]   ;;  %s207_s3 = inlined_call_operand.vmem [shape: f32[1,32], index: 3, kind: input, shape index: {}]   ;;  %s208_s4 = inlined_call_operand.hbm [shape: f32[16,32], index: 4, kind: output, shape index: {}]  }
   0x1   :  { %v18_v0 = vld [vmem:[%s204_s0] sm:$0xff]  ;;  %v19_v2 = vld [vmem:[%s204_s0 + $0x8] sm:$0xff] }
   0x2   :  { %v20_v1 = vld [vmem:[%s205_s1] sm:$0xff]  ;;  %v21_v4 = vld [vmem:[%s205_s1 + $0x8] sm:$0xff] }
   0x3   :  { %v22_v3 = vadd.f32 %v20_v1, %v18_v0 }
   0x4   :  { %9 = vsyncpa [#allocation3], 0  ;;  %v23_v5 = vadd.f32 %v21_v4, %v19_v2  ;;  %v103_v34 = vld [vmem:[%s206_s2] ss:$0 sm:$0xff]  ;;  %s140_s25 = smov [#allocation2]  }
   0x5   :  { %v25_v6 = vsel %vm24_vm0, %v22_v3, 0.0  ;;  %v104_v37 = vld [vmem:[%s207_s3] ss:$0 sm:$0xff]  ;;  %s92_s26 = sshll.u32 %s140_s25, 4  ;;  %s93_s26 = int_to_ptr.vmem [resolvable:$true] %s92_s26 }
   0x6   :  { %26 = vadd.xlane.f32.xlu0 %v25_v6  ;;  %v28_v7 = vsel %vm24_vm0, %v23_v5, 0.0  ;;  %s116_s2 = scalar_lea.vmem %s93_s26, 256  ;;  %p121_p1 = scmp.lt.s32.totalorder %s93_s26, %s93_s26 }
   0x7   :  { %p117_p0 = scmp.ne.s32.totalorder %s93_s26, %s116_s2  ;;  %p122_p2 = scmp.lt.s32.totalorder %s116_s2, %s116_s2 }
   0x9   :  { %p123_p3 = por %p122_p2, %p121_p1 }
   0xa   :  { %29 = vadd.xlane.f32.xlu0 %v28_v7 }
   0xb   :  { %p124_p4 = pnand %p123_p3, %p117_p0 }
  0x93   :  { %v27_v8 = vpop.xlane.xlu0 %26 }
  0x94   :  { %v32_v9 = vmul.f32 0.03125, %v27_v8 }
  0x96   :  { %v34_v10 = vsub.f32 %v22_v3, %v32_v9 }
  0x97   :  { %v30_v11 = vpop.xlane.xlu0 %29 }
  0x98   :  { %v33_v12 = vmul.f32 0.03125, %v30_v11  ;;  %v36_v13 = vmul.f32 %v34_v10, %v34_v10  ;;  %v68_v35 = vmul.f32 %v103_v34, %v34_v10 }
  0x9a   :  { %v35_v14 = vsub.f32 %v23_v5, %v33_v12  ;;  %v38_v15 = vsel %vm24_vm0, %v36_v13, 0.0 }
  0x9b   :  { %39 = vadd.xlane.f32.xlu1 %v38_v15 }
  0x9c   :  { %v37_v16 = vmul.f32 %v35_v14, %v35_v14  ;;  %v69_v39 = vmul.f32 %v103_v34, %v35_v14 }
  0x9e   :  { %v41_v17 = vsel %vm24_vm0, %v37_v16, 0.0 }
  0x9f   :  { %42 = vadd.xlane.f32.xlu1 %v41_v17 }
 0x128   :  { %v40_v18 = vpop.xlane.xlu1 %39 }
 0x129   :  { %v45_v19 = vmul.f32 0.032258064, %v40_v18 }
 0x12b   :  { %108 = vrsqrt.f32 %v45_v19  ;;  %vm49_vm1 = vcmp.eq.f32.partialorder %v45_v19, inf  ;;  %v52_v24 = vand.u32 2147483648, %v45_v19  ;;  %vm51_vm2 = vcmp.eq.f32.partialorder %v45_v19, 0.0 }
 0x12c   :  { %v43_v20 = vpop.xlane.xlu1 %42 }
 0x12d   :  { %v46_v21 = vmul.f32 0.032258064, %v43_v20 }
 0x12f   :  { %110 = vrsqrt.f32 %v46_v21  ;;  %vm56_vm3 = vcmp.eq.f32.partialorder %v46_v21, inf  ;;  %v59_v30 = vand.u32 2147483648, %v46_v21  ;;  %vm58_vm4 = vcmp.eq.f32.partialorder %v46_v21, 0.0 }
 0x135   :  { %v109_v22 = vpop.eup %108 }
 0x136   :  { %v48_v23 = vmul.f32 %v109_v22, %v45_v19 }
 0x138   :  { %v50_v25 = vsel %vm49_vm1, %v45_v19, %v48_v23 }
 0x139   :  { %v111_v26 = vpop.eup %110  ;;  %v53_v27 = vsel %vm51_vm2, %v52_v24, %v50_v25 }
 0x13a   :  { %v70_v28 = vadd.f32 1e-10, %v53_v27  ;;  %v55_v29 = vmul.f32 %v111_v26, %v46_v21 }
 0x13c   :  { %112 = vrcp.f32 %v70_v28  ;;  %v57_v31 = vsel %vm56_vm3, %v46_v21, %v55_v29 }
 0x13d   :  { %v60_v32 = vsel %vm58_vm4, %v59_v30, %v57_v31 }
 0x13e   :  { %v71_v33 = vadd.f32 1e-10, %v60_v32 }
 0x140   :  { %114 = vrcp.f32 %v71_v33 }
 0x146   :  { %v113_v36 = vpop.eup %112 }
 0x147   :  { %v73_v38 = vmul.f32 %v113_v36, %v68_v35 }
 0x149   :  { %v83_v40 = vadd.f32 %v104_v37, %v73_v38 }
 0x14a   :  { %v115_v41 = vpop.eup %114 }
 0x14b   :  { %v75_v42 = vmul.f32 %v115_v41, %v69_v39  ;;  %85 = vst.msk [vmem:[#allocation2] sm:$0xff] %vm24_vm0, %v83_v40 }
 0x14d   :  { %v84_v43 = vadd.f32 %v104_v37, %v75_v42 }
 0x14f   :  { %86 = vst.msk [vmem:[#allocation2 + $0x8] sm:$0xff] %vm24_vm0, %v84_v43 }
 0x150   :  { %127 = shalt.err (!%p124_p4)
}
 0x151   :  { %s128_s28 = scalar_lea.hbm %s208_s4, 256 }
 0x152   :  { %p129_p5 = scmp.ne.s32.totalorder %s208_s4, %s128_s28  ;;  %p132_p6 = scmp.lt.u32.totalorder %s128_s28, %s208_s4 }
 0x154   :  { %p134_p7 = pnand %p132_p6, %p129_p5 }
 0x156   :  { %137 = shalt.err (!%p134_p7)
}
 0x157   :  { %s141_s7 = smov 128   ;;  %s142_s8 = smov 8  }
 0x158   :  { %98 = dma.vmem_to_hbm [thread:$0]  %s93_s26, 256, %s208_s4, [#allocation3], %s141_s7, %s141_s7, %s142_s8  }
 0x159   :  { %138 = dma.done.wait [#allocation3], 256  }
 0x15a   :  { %139 = vsyncadd [#allocation3], 4294967040 }
 0x15b   :  { %102 = vsyncpa [#allocation3], 1 }

// kernel: encoder_forward.16
= control target key start
LH: loop header
LB: loop body
LE: loop exit
PB: predicated region body
PF: predicated region fallthrough
CT: control target
= control target key end

     0   :  { %vm33_vm0 = vcmask 261120   ;;  %vm585_vm1 = vcmask 523264   ;;  %s1886_s1 = inlined_call_operand.vmem [shape: f32[32,64], index: 1, kind: input, shape index: {}]   ;;  %s1887_s0 = inlined_call_operand.vmem [shape: f32[16,32], index: 0, kind: input, shape index: {}]   ;;  %s1888_s3 = inlined_call_operand.vmem [shape: f32[64,32], index: 3, kind: input, shape index: {}]   ;;  %s1889_s2 = inlined_call_operand.vmem [shape: f32[1,64], index: 2, kind: input, shape index: {}]   ;;  %s1890_s4 = inlined_call_operand.vmem [shape: f32[1,32], index: 4, kind: input, shape index: {}]   ;;  %s1891_s5 = inlined_call_operand.vmem [shape: f32[16,32], index: 5, kind: output, shape index: {}]  }
   0x1   :  { %v22_v0 = vld [vmem:[%s1886_s1] sm:$0xff]  ;;  %v23_v1 = vld [vmem:[%s1886_s1 + $0x8] sm:$0xff]  ;;  %v24_v2 = vld [vmem:[%s1886_s1 + $0x10] sm:$0xff] }
   0x2   :  { %v41_v3 = vand.u32 4294901760, %v22_v0  ;;  %v44_v4 = vand.u32 4294901760, %v23_v1  ;;  %v25_v5 = vld [vmem:[%s1886_s1 + $0x18] sm:$0xff]  ;;  %v47_v6 = vand.u32 4294901760, %v24_v2  ;;  %v20_v7 = vld [vmem:[%s1887_s0] sm:$0xff]  ;;  %v21_v8 = vld [vmem:[%s1887_s0 + $0x8] sm:$0xff] }
   0x3   :  { %v50_v9 = vand.u32 4294901760, %v25_v5  ;;  %v35_v10 = vsel %vm33_vm0, %v20_v7, 0  ;;  %v38_v11 = vsel %vm33_vm0, %v21_v8, 0  ;;  %v1693_v20 = vld [vmem:[%s1888_s3] sm:$0xff]  ;;  %v1716_v30 = vld [vmem:[%s1888_s3 + $0x8] sm:$0xff]  ;;  %v1731_v35 = vld [vmem:[%s1888_s3 + $0x10] sm:$0xff] }
   0x4   :  { %v1674_v12 = vpack.c.bf16 %v44_v4, %v41_v3  ;;  %v1676_v13 = vand.u32 4294901760, %v35_v10  ;;  %v1678_v14 = vand.u32 4294901760, %v38_v11  ;;  %v1680_v15 = vsub.f32 %v22_v0, %v41_v3  ;;  %v1744_v43 = vld [vmem:[%s1888_s3 + $0x18] sm:$0xff] }
   0x5   :  { %v1682_v16 = vpack.c.bf16 %v50_v9, %v47_v6  ;;  %v1684_v17 = vsub.f32 %v23_v1, %v44_v4  ;;  %v1686_v18 = vsub.f32 %v24_v2, %v47_v6  ;;  %v1688_v19 = vsub.f32 %v25_v5, %v50_v9 }
   0x6   :  { %1457 = vmatprep.subr.bf16.mxu0 %v1674_v12  ;;  %v1697_v21 = vsub.f32 %v35_v10, %v1676_v13  ;;  %v1700_v22 = vsub.f32 %v38_v11, %v1678_v14  ;;  %v132_v23 = vand.u32 4294901760, %v1680_v15  ;;  %v593_v31 = vand.u32 4294901760, %v1693_v20  ;;  %v574_v10 = vld [vmem:[%s1888_s3 + $0x20] sm:$0xff]  ;;  %v575_v11 = vld [vmem:[%s1888_s3 + $0x28] sm:$0xff] }
   0x7   :  { %1459 = vmatpush3.bf16.msra.mxu0 %v1674_v12  ;;  %v139_v24 = vand.u32 4294901760, %v1684_v17  ;;  %v146_v25 = vand.u32 4294901760, %v1686_v18  ;;  %v153_v26 = vand.u32 4294901760, %v1688_v19  ;;  %v596_v42 = vand.u32 4294901760, %v1716_v30 }
   0x8   :  { %1461 = vmatprep.subr.bf16.mxu0 %v1682_v16  ;;  %v111_v27 = vand.u32 4294901760, %v1697_v21  ;;  %v121_v28 = vand.u32 4294901760, %v1700_v22  ;;  %v133_v29 = vsub.f32 %v1680_v15, %v132_v23  ;;  %v1749_v46 = vsub.f32 %v1693_v20, %v593_v31 }
   0x9   :  { %v140_v32 = vsub.f32 %v1684_v17, %v139_v24  ;;  %v147_v33 = vsub.f32 %v1686_v18, %v146_v25  ;;  %v154_v34 = vsub.f32 %v1688_v19, %v153_v26  ;;  %v599_v47 = vand.u32 4294901760, %v1731_v35 }
   0xa   :  { %v112_v36 = vsub.f32 %v1697_v21, %v111_v27  ;;  %v122_v37 = vsub.f32 %v1700_v22, %v121_v28  ;;  %v134_v38 = vand.u32 4294901760, %v133_v29  ;;  %v1755_v50 = vsub.f32 %v1716_v30, %v596_v42 }
   0xb   :  { %1463 = vmatpush3.bf16.msra.mxu0 %v1682_v16  ;;  %v141_v39 = vand.u32 4294901760, %v140_v32  ;;  %v148_v40 = vand.u32 4294901760, %v147_v33  ;;  %v155_v41 = vand.u32 4294901760, %v154_v34  ;;  %v688_v51 = vand.u32 4294901760, %v1749_v46 }
   0xc   :  { %v113_v44 = vand.u32 4294901760, %v112_v36  ;;  %v123_v45 = vand.u32 4294901760, %v122_v37  ;;  %v602_v52 = vand.u32 4294901760, %v1744_v43  ;;  %v1760_v53 = vsub.f32 %v1731_v35, %v599_v47 }
   0xd   :  { %v1464_v48 = vpack.c.bf16 %v141_v39, %v134_v38  ;;  %v1468_v49 = vpack.c.bf16 %v155_v41, %v148_v40  ;;  %v695_v54 = vand.u32 4294901760, %v1755_v50  ;;  %v689_v55 = vsub.f32 %v1749_v46, %v688_v51 }
   0xe   :  { %1284 = vmatprep.mubr.f32.mxu0 %v113_v44  ;;  %v702_v56 = vand.u32 4294901760, %v1760_v53  ;;  %v1769_v57 = vsub.f32 %v1744_v43, %v602_v52  ;;  %v1472_v58 = vpack.c.bf16 %v1684_v17, %v1680_v15  ;;  %v1476_v2 = vpack.c.bf16 %v1688_v19, %v1686_v18  ;;  %v577_v17 = vld [vmem:[%s1888_s3 + $0x38] sm:$0xff]  ;;  %v1178_v43 = vld [vmem:[%s1889_s2] ss:$0 sm:$0xff] }
   0xf   :  { %1285 = vmatmul.mubr.f32.vlgmr.msra.gmra.mrb[0].mxu0 %v123_v45  ;;  %1465 = vmatprep.subr.bf16.mxu0 %v1464_v48  ;;  %v696_v59 = vsub.f32 %v1755_v50, %v695_v54  ;;  %v690_v60 = vand.u32 4294901760, %v689_v55  ;;  %v1488_v6 = vpack.c.bf16 %v139_v24, %v132_v23  ;;  %v1492_v7 = vpack.c.bf16 %v153_v26, %v146_v25 }
  0x10   :  { %1467 = vmatpush3.bf16.msra.mxu0 %v1464_v48  ;;  %1295 = vmatprep.mubr.f32.mxu0 %v1676_v13  ;;  %v703_v61 = vsub.f32 %v1760_v53, %v702_v56  ;;  %v709_v62 = vand.u32 4294901760, %v1769_v57  ;;  %v1814_v8 = vpack.c.bf16 %v596_v42, %v593_v31  ;;  %v1817_v9 = vpack.c.bf16 %v602_v52, %v599_v47 }
  0x11   :  { %1469 = vmatprep.subr.bf16.mxu0 %v1468_v49  ;;  %v697_v63 = vand.u32 4294901760, %v696_v59  ;;  %v1536_v36 = vpack.c.bf16 %v1755_v50, %v1749_v46 }
  0x12   :  { %v704_v0 = vand.u32 4294901760, %v703_v61  ;;  %v710_v1 = vsub.f32 %v1769_v57, %v709_v62 }
  0x13   :  { %v1520_v3 = vpack.c.bf16 %v697_v63, %v690_v60  ;;  %v1540_v63 = vpack.c.bf16 %v1769_v57, %v1760_v53 }
  0x14   :  { %1471 = vmatpush3.bf16.msra.mxu0 %v1468_v49  ;;  %v711_v4 = vand.u32 4294901760, %v710_v1 }
  0x15   :  { %1473 = vmatprep.subr.bf16.mxu0 %v1472_v58  ;;  %1521 = vmatprep.subr.bf16.mxu1 %v1520_v3 }
  0x16   :  { %v1524_v5 = vpack.c.bf16 %v711_v4, %v704_v0  ;;  %1523 = vmatpush3.bf16.msra.mxu1 %v1520_v3 }
  0x17   :  { %1296 = vmatmul.mubr.f32.vlgmr.msra.gmra.mrb[0].mxu0 %v1678_v14 }
  0x18   :  { %1475 = vmatpush3.bf16.msra.mxu0 %v1472_v58  ;;  %1306 = vmatprep.mubr.f32.mxu0 %v1697_v21  ;;  %v614_v21 = vand.u32 4294901760, %v577_v17 }
  0x19   :  { %1477 = vmatprep.subr.bf16.mxu0 %v1476_v2  ;;  %1525 = vmatprep.subr.bf16.mxu1 %v1524_v5 }
  0x1a   :  { %1527 = vmatpush3.bf16.msra.mxu1 %v1524_v5  ;;  %v736_v25 = vsub.f32 %v577_v17, %v614_v21 }
  0x1c   :  { %1479 = vmatpush3.bf16.msra.mxu0 %v1476_v2  ;;  %v737_v29 = vand.u32 4294901760, %v736_v25 }
  0x1d   :  { %1481 = vmatprep.subr.bf16.mxu0 %v1674_v12 }
  0x1e   :  { %v738_v32 = vsub.f32 %v736_v25, %v737_v29 }
  0x1f   :  { %1307 = vmatmul.mubr.f32.vlgmr.msra.gmra.mrb[0].mxu0 %v1700_v22 }
  0x20   :  { %1483 = vmatpush3.bf16.msra.mxu0 %v1674_v12  ;;  %1317 = vmatprep.mubr.f32.mxu0 %v111_v27  ;;  %v739_v34 = vand.u32 4294901760, %v738_v32 }
  0x21   :  { %1485 = vmatprep.subr.bf16.mxu0 %v1682_v16 }
  0x24   :  { %1487 = vmatpush3.bf16.msra.mxu0 %v1682_v16 }
  0x25   :  { %1489 = vmatprep.subr.bf16.mxu0 %v1488_v6 }
  0x27   :  { %1318 = vmatmul.mubr.f32.vlgmr.msra.gmra.mrb[0].mxu0 %v121_v28 }
  0x28   :  { %1491 = vmatpush3.bf16.msra.mxu0 %v1488_v6  ;;  %1328 = vmatprep.mubr.f32.mxu0 %v1676_v13 }
  0x29   :  { %1493 = vmatprep.subr.bf16.mxu0 %v1492_v7 }
  0x2c   :  { %1495 = vmatpush3.bf16.msra.mxu0 %v1492_v7  ;;  %v1568_v7 = vpack.c.bf16 %v695_v54, %v688_v51  ;;  %v1179_v51 = vld [vmem:[%s1890_s4] ss:$0 sm:$0xff] }
  0x2d   :  { %1497 = vmatprep.subr.bf16.mxu0 %v1674_v12 }
  0x2f   :  { %1329 = vmatmul.mubr.f32.vlgmr.msra.gmra.mrb[0].mxu0 %v1678_v14 }
  0x30   :  { %1499 = vmatpush3.bf16.msra.mxu0 %v1674_v12  ;;  %1339 = vmatprep.mubr.f32.mxu0 %v1676_v13  ;;  %v605_v12 = vand.u32 4294901760, %v574_v10  ;;  %v608_v13 = vand.u32 4294901760, %v575_v11 }
  0x31   :  { %1501 = vmatprep.subr.bf16.mxu0 %v1682_v16 }
  0x32   :  { %v715_v15 = vsub.f32 %v574_v10, %v605_v12  ;;  %v1838_v37 = vpack.c.bf16 %v608_v13, %v605_v12  ;;  %v1572_v10 = vpack.c.bf16 %v709_v62, %v702_v56 }
  0x34   :  { %1503 = vmatpush3.bf16.msra.mxu0 %v1682_v16  ;;  %v722_v16 = vsub.f32 %v575_v11, %v608_v13  ;;  %v716_v18 = vand.u32 4294901760, %v715_v15 }
  0x35   :  { %1505 = vmatprep.subr.bf16.mxu0 %v1814_v8 }
  0x36   :  { %v723_v19 = vand.u32 4294901760, %v722_v16  ;;  %v717_v22 = vsub.f32 %v715_v15, %v716_v18  ;;  %v1544_v39 = vpack.c.bf16 %v722_v16, %v715_v15 }
  0x37   :  { %1340 = vmatmul.mubr.f32.vlgmr.msra.gmra.mrb[0].mxu0 %v1678_v14  ;;  %v576_v14 = vld [vmem:[%s1888_s3 + $0x30] sm:$0xff] }
  0x38   :  { %1507 = vmatpush3.bf16.msra.mxu0 %v1814_v8  ;;  %v611_v20 = vand.u32 4294901760, %v576_v14  ;;  %v724_v23 = vsub.f32 %v722_v16, %v723_v19  ;;  %v718_v26 = vand.u32 4294901760, %v717_v22  ;;  %v1576_v41 = vpack.c.bf16 %v723_v19, %v716_v18 }
  0x39   :  { %1509 = vmatprep.subr.bf16.mxu0 %v1817_v9 }
  0x3a   :  { %v729_v24 = vsub.f32 %v576_v14, %v611_v20  ;;  %v725_v27 = vand.u32 4294901760, %v724_v23  ;;  %v1840_v38 = vpack.c.bf16 %v614_v21, %v611_v20 }
  0x3c   :  { %1511 = vmatpush3.bf16.msra.mxu0 %v1817_v9  ;;  %v730_v28 = vand.u32 4294901760, %v729_v24  ;;  %v1528_v30 = vpack.c.bf16 %v725_v27, %v718_v26  ;;  %v1548_v40 = vpack.c.bf16 %v736_v25, %v729_v24 }
  0x3d   :  { %1513 = vmatprep.subr.bf16.mxu0 %v1838_v37 }
  0x3e   :  { %v731_v31 = vsub.f32 %v729_v24, %v730_v28  ;;  %1529 = vmatprep.subr.bf16.mxu1 %v1528_v30  ;;  %v1580_v42 = vpack.c.bf16 %v737_v29, %v730_v28 }
  0x3f   :  { %1531 = vmatpush3.bf16.msra.mxu1 %v1528_v30 }
  0x40   :  { %v732_v33 = vand.u32 4294901760, %v731_v31  ;;  %1515 = vmatpush3.bf16.msra.mxu0 %v1838_v37 }
  0x41   :  { %1517 = vmatprep.subr.bf16.mxu0 %v1840_v38 }
  0x42   :  { %v1532_v35 = vpack.c.bf16 %v739_v34, %v732_v33 }
  0x44   :  { %1533 = vmatprep.subr.bf16.mxu1 %v1532_v35  ;;  %1519 = vmatpush3.bf16.msra.mxu0 %v1840_v38 }
  0x45   :  { %1535 = vmatpush3.bf16.msra.mxu1 %v1532_v35 }
  0x46   :  { %1537 = vmatprep.subr.bf16.mxu1 %v1536_v36 }
 0x10a   :  { %v1341_v44 = vpop.f32.mrb[0].mxu0 }
 0x10b   :  { %v1600_v45 = vadd.f32 %v1341_v44, %v1178_v43  ;;  %v558_v47 = vpop.f32.mrb[1].mxu0 }
 0x10c   :  { %v1601_v48 = vadd.f32 %v1178_v43, %v558_v47 }
 0x10d   :  { %v569_v49 = vmax.f32 %v1600_v45, 0.0 }
 0x10e   :  { %v568_v52 = vmax.f32 %v1601_v48, 0.0 }
 0x10f   :  { %v590_v55 = vsel %vm585_vm1, %v569_v49, 0 }
 0x110   :  { %v675_v58 = vand.u32 4294901760, %v590_v55  ;;  %v587_v59 = vsel %vm585_vm1, %v568_v52, 0 }
 0x111   :  { %v665_v60 = vand.u32 4294901760, %v587_v59 }
 0x112   :  { %v676_v61 = vsub.f32 %v590_v55, %v675_v58 }
 0x113   :  { %1377 = vmatprep.mubr.f32.mxu1 %v665_v60  ;;  %v666_v0 = vsub.f32 %v587_v59, %v665_v60 }
 0x114   :  { %v677_v1 = vand.u32 4294901760, %v676_v61  ;;  %1378 = vmatmul.mubr.f32.vlgmr.msra.gmra.mrb[0].mxu1 %v675_v58 }
 0x115   :  { %1539 = vmatpush3.bf16.msra.mxu1 %v1536_v36  ;;  %1396 = vmatprep.mubr.f32.mxu1 %v666_v0  ;;  %v667_v2 = vand.u32 4294901760, %v666_v0 }
 0x116   :  { %1541 = vmatprep.subr.bf16.mxu1 %v1540_v63  ;;  %v678_v3 = vsub.f32 %v676_v61, %v677_v1 }
 0x117   :  { %v668_v4 = vsub.f32 %v666_v0, %v667_v2 }
 0x118   :  { %v679_v6 = vand.u32 4294901760, %v678_v3 }
 0x119   :  { %1543 = vmatpush3.bf16.msra.mxu1 %v1540_v63  ;;  %v669_v5 = vand.u32 4294901760, %v668_v4 }
 0x11a   :  { %1545 = vmatprep.subr.bf16.mxu1 %v1544_v39 }
 0x11b   :  { %1358 = vmatprep.mubr.f32.mxu0 %v669_v5 }
 0x11c   :  { %1359 = vmatmul.mubr.f32.vlgmr.msra.gmra.mrb[2].mxu0 %v679_v6 }
 0x11d   :  { %1547 = vmatpush3.bf16.msra.mxu1 %v1544_v39 }
 0x11e   :  { %1549 = vmatprep.subr.bf16.mxu1 %v1548_v40 }
 0x121   :  { %1551 = vmatpush3.bf16.msra.mxu1 %v1548_v40 }
 0x122   :  { %1553 = vmatprep.subr.bf16.mxu1 %v1814_v8 }
 0x124   :  { %1397 = vmatmul.mubr.f32.vlgmr.msra.gmra.mrb[0].mxu1 %v676_v61 }
 0x125   :  { %1555 = vmatpush3.bf16.msra.mxu1 %v1814_v8  ;;  %1415 = vmatprep.mubr.f32.mxu1 %v667_v2 }
 0x126   :  { %1557 = vmatprep.subr.bf16.mxu1 %v1817_v9 }
 0x129   :  { %1559 = vmatpush3.bf16.msra.mxu1 %v1817_v9 }
 0x12a   :  { %1561 = vmatprep.subr.bf16.mxu1 %v1838_v37 }
 0x12d   :  { %1563 = vmatpush3.bf16.msra.mxu1 %v1838_v37 }
 0x12e   :  { %1565 = vmatprep.subr.bf16.mxu1 %v1840_v38 }
 0x131   :  { %1567 = vmatpush3.bf16.msra.mxu1 %v1840_v38 }
 0x132   :  { %1569 = vmatprep.subr.bf16.mxu1 %v1568_v7 }
 0x134   :  { %1416 = vmatmul.mubr.f32.vlgmr.msra.gmra.mrb[0].mxu1 %v677_v1 }
 0x135   :  { %1571 = vmatpush3.bf16.msra.mxu1 %v1568_v7  ;;  %1434 = vmatprep.mubr.f32.mxu1 %v665_v60 }
 0x136   :  { %1573 = vmatprep.subr.bf16.mxu1 %v1572_v10 }
 0x139   :  { %1575 = vmatpush3.bf16.msra.mxu1 %v1572_v10 }
 0x13a   :  { %1577 = vmatprep.subr.bf16.mxu1 %v1576_v41 }
 0x13d   :  { %1579 = vmatpush3.bf16.msra.mxu1 %v1576_v41 }
 0x13e   :  { %1581 = vmatprep.subr.bf16.mxu1 %v1580_v42 }
 0x141   :  { %1583 = vmatpush3.bf16.msra.mxu1 %v1580_v42 }
 0x142   :  { %1585 = vmatprep.subr.bf16.mxu1 %v1814_v8 }
 0x144   :  { %1435 = vmatmul.mubr.f32.vlgmr.msra.gmra.mrb[0].mxu1 %v675_v58 }
 0x145   :  { %1587 = vmatpush3.bf16.msra.mxu1 %v1814_v8  ;;  %1453 = vmatprep.mubr.f32.mxu1 %v665_v60 }
 0x146   :  { %1589 = vmatprep.subr.bf16.mxu1 %v1817_v9 }
 0x149   :  { %1591 = vmatpush3.bf16.msra.mxu1 %v1817_v9 }
 0x14a   :  { %1593 = vmatprep.subr.bf16.mxu1 %v1838_v37 }
 0x14d   :  { %1595 = vmatpush3.bf16.msra.mxu1 %v1838_v37 }
 0x14e   :  { %1597 = vmatprep.subr.bf16.mxu1 %v1840_v38 }
 0x151   :  { %1599 = vmatpush3.bf16.msra.mxu1 %v1840_v38 }
 0x154   :  { %1454 = vmatmul.mubr.f32.vlgmr.msra.gmra.mrb[0].mxu1 %v675_v58 }
 0x1ef   :  { %v1360_v46 = vpop.f32.mrb[2].mxu0 }
 0x1f0   :  { %v671_v50 = vpop.f32.mrb[3].mxu0  ;;  %v682_v53 = vadd.f32 %v1360_v46, %v1179_v51 }
 0x1f1   :  { %v672_v54 = vadd.f32 %v1179_v51, %v671_v50 }
 0x227   :  { %v1455_v56 = vpop.f32.mrb[0].mxu1 }
 0x228   :  { %v1603_v57 = vadd.f32 %v1455_v56, %v682_v53  ;;  %v1162_v62 = vpop.f32.mrb[1].mxu1 }
 0x229   :  { %v1605_v8 = vadd.f32 %v1162_v62, %v672_v54 }
 0x22a   :  { %1173 = vst.msk [vmem:[%s1891_s5 + $0x8] sm:$0xff] %vm33_vm0, %v1603_v57 }
 0x22b   :  { %1172 = vst.msk [vmem:[%s1891_s5] sm:$0xff] %vm33_vm0, %v1605_v8 }

</bundles_post_ra>
